<compile_context>
chip_gen: v7x
topology: tpu7x:2x2x1
jax: 0.10.0
libtpu: 0.0.40
codegen_flags: <defaults>
</compile_context>

<pallas_src>
import functools

import jax
import jax.numpy as jnp
from jax.experimental import pallas as pl
from jax.experimental.pallas import tpu as pltpu


def _pick_tile_b(batch):
    # Largest tile that still leaves >= 4 grid steps (>= 2 per TensorCore on v7x);
    # fall back to 128 rows (MXU-friendly minimum) for small batches.
    for tile in (512, 256, 128):
        if batch >= 4 * tile:
            return tile
    return 128


def _leaky_relu(v):
    # LeakyReLU(negative_slope=0.2), computed in f32
    return jnp.where(v > 0, v, 0.2 * v)


def vae_kernel(
    # per-batch-tile activations first, then VMEM-resident weights/biases
    x_ref, noise_ref,
    w1_ref, b1_ref,          # encoder FC_input
    w2_ref, b2_ref,          # encoder FC_input2
    wmv_ref, bmv_ref,        # fused encoder FC_mean | FC_var  ([hidden, 2*latent])
    wd1_ref, bd1_ref,        # decoder FC_hidden (rows zero-padded to 2*latent)
    wd2_ref, bd2_ref,        # decoder FC_hidden2
    wo_ref, bo_ref,          # decoder FC_output
    # outputs
    xhat_ref, mv_ref,
    *, latent_dim,
):
    def mm(a, w_ref):
        w = w_ref[...]  # bf16 weights; cast activations only at the MXU boundary
        return jnp.dot(a.astype(w.dtype), w, preferred_element_type=jnp.float32)

    x = x_ref[...]                                   # bf16 activation tile

    # ---------------- encoder ----------------
    h = _leaky_relu(mm(x, w1_ref) + b1_ref[...])
    h = _leaky_relu(mm(h, w2_ref) + b2_ref[...])
    mv = mm(h, wmv_ref) + bmv_ref[...]               # [TILE_B, 2L] = [mean | log_var], f32
    mv_ref[...] = mv                                 # single lane-dense f32 store

    # ---------------- reparametrization ----------------
    # TODO(synk): torch.randn_like is emulated with host-generated N(0,1) noise passed
    # in as an input (pltpu.prng_seed + stateful_normal could generate it in-kernel and
    # save the DMA, but an explicit input keeps the kernel deterministic/checkable).
    mean = mv[:, :latent_dim]
    log_var = mv[:, latent_dim:]
    noise = noise_ref[...].astype(jnp.float32)
    z = mean + jnp.exp(0.5 * log_var) * noise        # [TILE_B, L]
    # zero-pad z to 2L (=128) lanes; wd1 rows [L:] are zero so padded lanes are inert
    z_full = jnp.concatenate([z, jnp.zeros_like(z)], axis=1)

    # ---------------- decoder ----------------
    d = _leaky_relu(mm(z_full, wd1_ref) + bd1_ref[...])
    d = _leaky_relu(mm(d, wd2_ref) + bd2_ref[...])
    logits = mm(d, wo_ref) + bo_ref[...]
    # sigmoid: exp + approximate reciprocal both land on the EUP slot
    xhat = pl.reciprocal(1.0 + jnp.exp(-logits), approx=True)
    xhat_ref[...] = xhat.astype(xhat_ref.dtype)


@jax.jit
def vae_forward(x, noise, params):
    """x: [B, input_dim] f32, noise: [B, latent_dim] f32 (N(0,1))."""
    B, input_dim = x.shape
    latent_dim = noise.shape[1]
    two_lat = 2 * latent_dim
    hidden_dim = params["w2"].shape[0]

    tile_b = _pick_tile_b(B)
    Bp = ((B + tile_b - 1) // tile_b) * tile_b

    # bf16 activation I/O (kernel is HBM-bound at these shapes)
    x_b = x.astype(jnp.bfloat16)
    noise_b = noise.astype(jnp.bfloat16)
    if Bp != B:
        x_b = jnp.pad(x_b, ((0, Bp - B), (0, 0)))
        noise_b = jnp.pad(noise_b, ((0, Bp - B), (0, 0)))

    inputs = (
        x_b, noise_b,
        params["w1"], params["b1"],
        params["w2"], params["b2"],
        params["wmv"], params["bmv"],
        params["wd1_p"], params["bd1"],
        params["wd2"], params["bd2"],
        params["wo"], params["bo"],
    )

    def act_spec(shape):
        return pl.BlockSpec(shape, lambda i: (i, 0))          # tiled over batch

    def resident_spec(arr):
        return pl.BlockSpec(arr.shape, lambda i: (0, 0))      # weights stay in VMEM

    in_specs = [
        act_spec((tile_b, input_dim)),          # x (bf16)
        act_spec((tile_b, latent_dim)),         # noise (bf16, unpadded: full array dim)
    ] + [resident_spec(a) for a in inputs[2:]]

    out_specs = (
        act_spec((tile_b, input_dim)),          # x_hat (bf16)
        act_spec((tile_b, two_lat)),            # [mean | log_var] (f32)
    )
    out_shape = (
        jax.ShapeDtypeStruct((Bp, input_dim), jnp.bfloat16),
        jax.ShapeDtypeStruct((Bp, two_lat), jnp.float32),
    )

    # advisory cost estimate for XLA's scheduler around this short custom call
    weight_bytes = sum(int(a.size) * a.dtype.itemsize for a in inputs[2:])
    flops = 2 * Bp * (
        input_dim * hidden_dim + hidden_dim * hidden_dim + hidden_dim * two_lat
        + two_lat * hidden_dim + hidden_dim * hidden_dim + hidden_dim * input_dim
    )
    bytes_accessed = (
        int(x_b.size) * 2 + int(noise_b.size) * 2          # bf16 inputs
        + weight_bytes                                      # resident params (fetched once)
        + Bp * input_dim * 2 + Bp * two_lat * 4             # bf16 x_hat + f32 mv
    )
    cost = pl.CostEstimate(
        flops=flops,
        transcendentals=Bp * (latent_dim + input_dim),
        bytes_accessed=bytes_accessed,
    )

    xhat_p, mv_p = pl.pallas_call(
        functools.partial(vae_kernel, latent_dim=latent_dim),
        grid=(Bp // tile_b,),
        in_specs=in_specs,
        out_specs=out_specs,
        out_shape=out_shape,
        compiler_params=pltpu.CompilerParams(
            dimension_semantics=("parallel",),   # v7x: shard batch tiles across 2 TCs
        ),
        cost_estimate=cost,
    )(*inputs)

    x_hat = xhat_p[:B]
    mean = mv_p[:B, :latent_dim]
    log_var = mv_p[:B, latent_dim:]
    return x_hat, mean, log_var


def init_params(key, input_dim, hidden_dim, latent_dim):
    """nn.Linear-style init; bf16 weights, f32 biases.

    Head fusion ([mean | log_var]) and wd1 zero-padding are done ONCE here, keeping
    all per-call wrapper work out of the hot path.
    """
    def linear(k, fan_in, fan_out):
        kw, kb = jax.random.split(k)
        bound = 1.0 / jnp.sqrt(jnp.float32(fan_in))
        w = jax.random.uniform(kw, (fan_in, fan_out), jnp.float32, -bound, bound)
        b = jax.random.uniform(kb, (1, fan_out), jnp.float32, -bound, bound)
        return w.astype(jnp.bfloat16), b

    keys = jax.random.split(key, 7)
    p = {}
    p["w1"], p["b1"] = linear(keys[0], input_dim, hidden_dim)     # FC_input
    p["w2"], p["b2"] = linear(keys[1], hidden_dim, hidden_dim)    # FC_input2
    wm, bm = linear(keys[2], hidden_dim, latent_dim)              # FC_mean
    wv, bv = linear(keys[3], hidden_dim, latent_dim)              # FC_var
    p["wmv"] = jnp.concatenate([wm, wv], axis=1)                  # fused head weight
    p["bmv"] = jnp.concatenate([bm, bv], axis=1)                  # fused head bias
    wd1, p["bd1"] = linear(keys[4], latent_dim, hidden_dim)       # FC_hidden
    p["wd1_p"] = jnp.concatenate([wd1, jnp.zeros_like(wd1)], axis=0)  # [2L, H], rows L: zero
    p["wd2"], p["bd2"] = linear(keys[5], hidden_dim, hidden_dim)  # FC_hidden2
    p["wo"], p["bo"] = linear(keys[6], hidden_dim, input_dim)     # FC_output
    return p


def reference_forward(x, noise, p):
    """Pure-JAX reference mirroring the kernel's bf16-matmul / f32-elementwise split."""
    def mm(a, w):
        return jnp.dot(a.astype(w.dtype), w, preferred_element_type=jnp.float32)

    lrelu = lambda v: jnp.where(v > 0, v, 0.2 * v)
    latent = noise.shape[1]
    xb = x.astype(jnp.bfloat16)
    nb = noise.astype(jnp.bfloat16).astype(jnp.float32)
    h = lrelu(mm(xb, p["w1"]) + p["b1"])
    h = lrelu(mm(h, p["w2"]) + p["b2"])
    mv = mm(h, p["wmv"]) + p["bmv"]
    mean, log_var = mv[:, :latent], mv[:, latent:]
    z = mean + jnp.exp(0.5 * log_var) * nb
    d = lrelu(mm(z, p["wd1_p"][:latent]) + p["bd1"])
    d = lrelu(mm(d, p["wd2"]) + p["bd2"])
    x_hat = jax.nn.sigmoid(mm(d, p["wo"]) + p["bo"])
    return x_hat, mean, log_var


if __name__ == "__main__":
    # MXU-friendly small shapes: batch fills the 128-row tile, two grid steps.
    B, INPUT_DIM, HIDDEN_DIM, LATENT_DIM = 256, 256, 128, 64

    root = jax.random.PRNGKey(0)
    k_x, k_noise, k_params = jax.random.split(root, 3)

    x = jax.random.uniform(k_x, (B, INPUT_DIM), jnp.float32)          # "image" in [0,1)
    noise = jax.random.normal(k_noise, (B, LATENT_DIM), jnp.float32)  # randn_like(sd)
    params = init_params(k_params, INPUT_DIM, HIDDEN_DIM, LATENT_DIM)

    x_hat, mean, log_var = vae_forward(x, noise, params)
    jax.block_until_ready((x_hat, mean, log_var))

    # Correctness check against the pure-JAX reference.
    ref_x_hat, ref_mean, ref_log_var = reference_forward(x, noise, params)
    assert x_hat.shape == (B, INPUT_DIM)
    assert mean.shape == (B, LATENT_DIM) and log_var.shape == (B, LATENT_DIM)
    # x_hat is produced in bf16 with an approximate reciprocal -> slightly looser tol.
    assert jnp.allclose(x_hat.astype(jnp.float32), ref_x_hat, atol=1e-2, rtol=1e-2)
    assert jnp.allclose(mean, ref_mean, atol=5e-3, rtol=5e-3)
    assert jnp.allclose(log_var, ref_log_var, atol=5e-3, rtol=5e-3)

    print("KERNEL_OK")
</pallas_src>

<mosaic_0001>
module attributes {stable_mosaic.version = 11 : i64} {
  func.func @vae_kernel(%arg0: i32, %arg1: memref<128x256xbf16, #tpu.memory_space<vmem>>, %arg2: memref<128x64xbf16, #tpu.memory_space<vmem>>, %arg3: memref<256x128xbf16, #tpu.memory_space<vmem>>, %arg4: memref<1x128xf32, #tpu.memory_space<vmem>>, %arg5: memref<128x128xbf16, #tpu.memory_space<vmem>>, %arg6: memref<1x128xf32, #tpu.memory_space<vmem>>, %arg7: memref<128x128xbf16, #tpu.memory_space<vmem>>, %arg8: memref<1x128xf32, #tpu.memory_space<vmem>>, %arg9: memref<128x128xbf16, #tpu.memory_space<vmem>>, %arg10: memref<1x128xf32, #tpu.memory_space<vmem>>, %arg11: memref<128x128xbf16, #tpu.memory_space<vmem>>, %arg12: memref<1x128xf32, #tpu.memory_space<vmem>>, %arg13: memref<128x256xbf16, #tpu.memory_space<vmem>>, %arg14: memref<1x256xf32, #tpu.memory_space<vmem>>, %arg15: memref<128x256xbf16, #tpu.memory_space<vmem>>, %arg16: memref<128x128xf32, #tpu.memory_space<vmem>>) attributes {dimension_semantics = [#tpu.dimension_semantics<parallel>], iteration_bounds = array<i64: 2>, scalar_prefetch = 0 : i64, scratch_operands = 0 : i64, tpu.core_type = #tpu.core_type<tc>, window_params = [{transform_indices = @transform_0, window_bounds = array<i64: 128, 256>}, {transform_indices = @transform_1, window_bounds = array<i64: 128, 64>}, {pipeline_mode = #tpu.pipeline_mode<synchronous>, transform_indices = @transform_2, window_bounds = array<i64: 256, 128>}, {pipeline_mode = #tpu.pipeline_mode<synchronous>, transform_indices = @transform_3, window_bounds = array<i64: 1, 128>}, {pipeline_mode = #tpu.pipeline_mode<synchronous>, transform_indices = @transform_4, window_bounds = array<i64: 128, 128>}, {pipeline_mode = #tpu.pipeline_mode<synchronous>, transform_indices = @transform_5, window_bounds = array<i64: 1, 128>}, {pipeline_mode = #tpu.pipeline_mode<synchronous>, transform_indices = @transform_6, window_bounds = array<i64: 128, 128>}, {pipeline_mode = #tpu.pipeline_mode<synchronous>, transform_indices = @transform_7, window_bounds = array<i64: 1, 128>}, {pipeline_mode = #tpu.pipeline_mode<synchronous>, transform_indices = @transform_8, window_bounds = array<i64: 128, 128>}, {pipeline_mode = #tpu.pipeline_mode<synchronous>, transform_indices = @transform_9, window_bounds = array<i64: 1, 128>}, {pipeline_mode = #tpu.pipeline_mode<synchronous>, transform_indices = @transform_10, window_bounds = array<i64: 128, 128>}, {pipeline_mode = #tpu.pipeline_mode<synchronous>, transform_indices = @transform_11, window_bounds = array<i64: 1, 128>}, {pipeline_mode = #tpu.pipeline_mode<synchronous>, transform_indices = @transform_12, window_bounds = array<i64: 128, 256>}, {pipeline_mode = #tpu.pipeline_mode<synchronous>, transform_indices = @transform_13, window_bounds = array<i64: 1, 256>}, {transform_indices = @transform_14, window_bounds = array<i64: 128, 256>}, {transform_indices = @transform_15, window_bounds = array<i64: 128, 128>}]} {
    %c0 = arith.constant 0 : index
    %c0_0 = arith.constant 0 : index
    %0 = vector.load %arg1[%c0, %c0_0] : memref<128x256xbf16, #tpu.memory_space<vmem>>, vector<128x256xbf16>
    %c0_1 = arith.constant 0 : index
    %c0_2 = arith.constant 0 : index
    %1 = vector.load %arg3[%c0_1, %c0_2] : memref<256x128xbf16, #tpu.memory_space<vmem>>, vector<256x128xbf16>
    %cst = arith.constant dense<0.000000e+00> : vector<128x128xf32>
    %2 = tpu.matmul %0, %1, %cst {dimension_numbers = #tpu.dot_dimension_numbers<[1], [0], [0], [1], [0, 0, 1, 1], [], []>} : vector<128x256xbf16>, vector<256x128xbf16>, vector<128x128xf32> -> vector<128x128xf32>
    %c0_3 = arith.constant 0 : index
    %c0_4 = arith.constant 0 : index
    %3 = vector.load %arg4[%c0_3, %c0_4] : memref<1x128xf32, #tpu.memory_space<vmem>>, vector<1x128xf32>
    %4 = vector.broadcast %3 : vector<1x128xf32> to vector<128x128xf32>
    %5 = arith.addf %2, %4 : vector<128x128xf32>
    %cst_5 = arith.constant 0.000000e+00 : f32
    %6 = vector.broadcast %cst_5 : f32 to vector<128x128xf32>
    %7 = arith.cmpf ogt, %5, %6 : vector<128x128xf32>
    %cst_6 = arith.constant 2.000000e-01 : f32
    %8 = vector.broadcast %cst_6 : f32 to vector<128x128xf32>
    %9 = arith.mulf %8, %5 : vector<128x128xf32>
    %10 = arith.select %7, %5, %9 : vector<128x128xi1>, vector<128x128xf32>
    %c0_7 = arith.constant 0 : index
    %c0_8 = arith.constant 0 : index
    %11 = vector.load %arg5[%c0_7, %c0_8] : memref<128x128xbf16, #tpu.memory_space<vmem>>, vector<128x128xbf16>
    %12 = arith.truncf %10 : vector<128x128xf32> to vector<128x128xbf16>
    %cst_9 = arith.constant dense<0.000000e+00> : vector<128x128xf32>
    %13 = tpu.matmul %12, %11, %cst_9 {dimension_numbers = #tpu.dot_dimension_numbers<[1], [0], [0], [1], [0, 0, 1, 1], [], []>} : vector<128x128xbf16>, vector<128x128xbf16>, vector<128x128xf32> -> vector<128x128xf32>
    %c0_10 = arith.constant 0 : index
    %c0_11 = arith.constant 0 : index
    %14 = vector.load %arg6[%c0_10, %c0_11] : memref<1x128xf32, #tpu.memory_space<vmem>>, vector<1x128xf32>
    %15 = vector.broadcast %14 : vector<1x128xf32> to vector<128x128xf32>
    %16 = arith.addf %13, %15 : vector<128x128xf32>
    %cst_12 = arith.constant 0.000000e+00 : f32
    %17 = vector.broadcast %cst_12 : f32 to vector<128x128xf32>
    %18 = arith.cmpf ogt, %16, %17 : vector<128x128xf32>
    %cst_13 = arith.constant 2.000000e-01 : f32
    %19 = vector.broadcast %cst_13 : f32 to vector<128x128xf32>
    %20 = arith.mulf %19, %16 : vector<128x128xf32>
    %21 = arith.select %18, %16, %20 : vector<128x128xi1>, vector<128x128xf32>
    %c0_14 = arith.constant 0 : index
    %c0_15 = arith.constant 0 : index
    %22 = vector.load %arg7[%c0_14, %c0_15] : memref<128x128xbf16, #tpu.memory_space<vmem>>, vector<128x128xbf16>
    %23 = arith.truncf %21 : vector<128x128xf32> to vector<128x128xbf16>
    %cst_16 = arith.constant dense<0.000000e+00> : vector<128x128xf32>
    %24 = tpu.matmul %23, %22, %cst_16 {dimension_numbers = #tpu.dot_dimension_numbers<[1], [0], [0], [1], [0, 0, 1, 1], [], []>} : vector<128x128xbf16>, vector<128x128xbf16>, vector<128x128xf32> -> vector<128x128xf32>
    %c0_17 = arith.constant 0 : index
    %c0_18 = arith.constant 0 : index
    %25 = vector.load %arg8[%c0_17, %c0_18] : memref<1x128xf32, #tpu.memory_space<vmem>>, vector<1x128xf32>
    %26 = vector.broadcast %25 : vector<1x128xf32> to vector<128x128xf32>
    %27 = arith.addf %24, %26 : vector<128x128xf32>
    %c0_19 = arith.constant 0 : index
    %c0_20 = arith.constant 0 : index
    %28 = vector.load %arg16[%c0_19, %c0_20] : memref<128x128xf32, #tpu.memory_space<vmem>>, vector<128x128xf32>
    tpu.vector_store %arg16[%c0_19, %c0_20], %27 {strides = array<i32>} : memref<128x128xf32, #tpu.memory_space<vmem>>, vector<128x128xf32>,
    %29 = vector.extract_strided_slice %27 {offsets = [0, 0], sizes = [128, 64], strides = [1, 1]} : vector<128x128xf32> to vector<128x64xf32>
    %30 = vector.extract_strided_slice %27 {offsets = [0, 64], sizes = [128, 64], strides = [1, 1]} : vector<128x128xf32> to vector<128x64xf32>
    %c0_21 = arith.constant 0 : index
    %c0_22 = arith.constant 0 : index
    %31 = vector.load %arg2[%c0_21, %c0_22] : memref<128x64xbf16, #tpu.memory_space<vmem>>, vector<128x64xbf16>
    %32 = arith.extf %31 : vector<128x64xbf16> to vector<128x64xf32>
    %cst_23 = arith.constant 5.000000e-01 : f32
    %33 = vector.broadcast %cst_23 : f32 to vector<128x64xf32>
    %34 = arith.mulf %33, %30 : vector<128x64xf32>
    %35 = math.exp %34 : vector<128x64xf32>
    %36 = arith.mulf %35, %32 : vector<128x64xf32>
    %37 = arith.addf %29, %36 : vector<128x64xf32>
    %cst_24 = arith.constant 0.000000e+00 : f32
    %38 = vector.broadcast %cst_24 : f32 to vector<128x64xf32>
    %39 = tpu.concatenate %37, %38 in 1 : vector<128x64xf32>, vector<128x64xf32> -> vector<128x128xf32>
    %c0_25 = arith.constant 0 : index
    %c0_26 = arith.constant 0 : index
    %40 = vector.load %arg9[%c0_25, %c0_26] : memref<128x128xbf16, #tpu.memory_space<vmem>>, vector<128x128xbf16>
    %41 = arith.truncf %39 : vector<128x128xf32> to vector<128x128xbf16>
    %cst_27 = arith.constant dense<0.000000e+00> : vector<128x128xf32>
    %42 = tpu.matmul %41, %40, %cst_27 {dimension_numbers = #tpu.dot_dimension_numbers<[1], [0], [0], [1], [0, 0, 1, 1], [], []>} : vector<128x128xbf16>, vector<128x128xbf16>, vector<128x128xf32> -> vector<128x128xf32>
    %c0_28 = arith.constant 0 : index
    %c0_29 = arith.constant 0 : index
    %43 = vector.load %arg10[%c0_28, %c0_29] : memref<1x128xf32, #tpu.memory_space<vmem>>, vector<1x128xf32>
    %44 = vector.broadcast %43 : vector<1x128xf32> to vector<128x128xf32>
    %45 = arith.addf %42, %44 : vector<128x128xf32>
    %cst_30 = arith.constant 0.000000e+00 : f32
    %46 = vector.broadcast %cst_30 : f32 to vector<128x128xf32>
    %47 = arith.cmpf ogt, %45, %46 : vector<128x128xf32>
    %cst_31 = arith.constant 2.000000e-01 : f32
    %48 = vector.broadcast %cst_31 : f32 to vector<128x128xf32>
    %49 = arith.mulf %48, %45 : vector<128x128xf32>
    %50 = arith.select %47, %45, %49 : vector<128x128xi1>, vector<128x128xf32>
    %c0_32 = arith.constant 0 : index
    %c0_33 = arith.constant 0 : index
    %51 = vector.load %arg11[%c0_32, %c0_33] : memref<128x128xbf16, #tpu.memory_space<vmem>>, vector<128x128xbf16>
    %52 = arith.truncf %50 : vector<128x128xf32> to vector<128x128xbf16>
    %cst_34 = arith.constant dense<0.000000e+00> : vector<128x128xf32>
    %53 = tpu.matmul %52, %51, %cst_34 {dimension_numbers = #tpu.dot_dimension_numbers<[1], [0], [0], [1], [0, 0, 1, 1], [], []>} : vector<128x128xbf16>, vector<128x128xbf16>, vector<128x128xf32> -> vector<128x128xf32>
    %c0_35 = arith.constant 0 : index
    %c0_36 = arith.constant 0 : index
    %54 = vector.load %arg12[%c0_35, %c0_36] : memref<1x128xf32, #tpu.memory_space<vmem>>, vector<1x128xf32>
    %55 = vector.broadcast %54 : vector<1x128xf32> to vector<128x128xf32>
    %56 = arith.addf %53, %55 : vector<128x128xf32>
    %cst_37 = arith.constant 0.000000e+00 : f32
    %57 = vector.broadcast %cst_37 : f32 to vector<128x128xf32>
    %58 = arith.cmpf ogt, %56, %57 : vector<128x128xf32>
    %cst_38 = arith.constant 2.000000e-01 : f32
    %59 = vector.broadcast %cst_38 : f32 to vector<128x128xf32>
    %60 = arith.mulf %59, %56 : vector<128x128xf32>
    %61 = arith.select %58, %56, %60 : vector<128x128xi1>, vector<128x128xf32>
    %c0_39 = arith.constant 0 : index
    %c0_40 = arith.constant 0 : index
    %62 = vector.load %arg13[%c0_39, %c0_40] : memref<128x256xbf16, #tpu.memory_space<vmem>>, vector<128x256xbf16>
    %63 = arith.truncf %61 : vector<128x128xf32> to vector<128x128xbf16>
    %cst_41 = arith.constant dense<0.000000e+00> : vector<128x256xf32>
    %64 = tpu.matmul %63, %62, %cst_41 {dimension_numbers = #tpu.dot_dimension_numbers<[1], [0], [0], [1], [0, 0, 1, 1], [], []>} : vector<128x128xbf16>, vector<128x256xbf16>, vector<128x256xf32> -> vector<128x256xf32>
    %c0_42 = arith.constant 0 : index
    %c0_43 = arith.constant 0 : index
    %65 = vector.load %arg14[%c0_42, %c0_43] : memref<1x256xf32, #tpu.memory_space<vmem>>, vector<1x256xf32>
    %66 = vector.broadcast %65 : vector<1x256xf32> to vector<128x256xf32>
    %67 = arith.addf %64, %66 : vector<128x256xf32>
    %cst_44 = arith.constant 0.000000e+00 : f32
    %68 = vector.broadcast %cst_44 : f32 to vector<128x256xf32>
    %69 = arith.subf %68, %67 : vector<128x256xf32>
    %70 = math.exp %69 : vector<128x256xf32>
    %cst_45 = arith.constant 1.000000e+00 : f32
    %71 = vector.broadcast %cst_45 : f32 to vector<128x256xf32>
    %72 = arith.addf %71, %70 : vector<128x256xf32>
    %73 = tpu.reciprocal %72 {approx = true} : vector<128x256xf32> -> vector<128x256xf32>
    %74 = arith.truncf %73 : vector<128x256xf32> to vector<128x256xbf16>
    %c0_46 = arith.constant 0 : index
    %c0_47 = arith.constant 0 : index
    %75 = vector.load %arg15[%c0_46, %c0_47] : memref<128x256xbf16, #tpu.memory_space<vmem>>, vector<128x256xbf16>
    tpu.vector_store %arg15[%c0_46, %c0_47], %74 {strides = array<i32>} : memref<128x256xbf16, #tpu.memory_space<vmem>>, vector<128x256xbf16>,
    return
  }
  func.func @transform_0(%arg0: i32) -> (i32, i32) {
    %c0_i32 = arith.constant 0 : i32
    %c0_i32_0 = arith.constant 0 : i32
    return %arg0, %c0_i32 : i32, i32
  }
  func.func @transform_1(%arg0: i32) -> (i32, i32) {
    %c0_i32 = arith.constant 0 : i32
    %c0_i32_0 = arith.constant 0 : i32
    return %arg0, %c0_i32 : i32, i32
  }
  func.func @transform_2(%arg0: i32) -> (i32, i32) {
    %c0_i32 = arith.constant 0 : i32
    %c0_i32_0 = arith.constant 0 : i32
    %c0_i32_1 = arith.constant 0 : i32
    return %c0_i32, %c0_i32_0 : i32, i32
  }
  func.func @transform_3(%arg0: i32) -> (i32, i32) {
    %c0_i32 = arith.constant 0 : i32
    %c0_i32_0 = arith.constant 0 : i32
    %c0_i32_1 = arith.constant 0 : i32
    return %c0_i32, %c0_i32_0 : i32, i32
  }
  func.func @transform_4(%arg0: i32) -> (i32, i32) {
    %c0_i32 = arith.constant 0 : i32
    %c0_i32_0 = arith.constant 0 : i32
    %c0_i32_1 = arith.constant 0 : i32
    return %c0_i32, %c0_i32_0 : i32, i32
  }
  func.func @transform_5(%arg0: i32) -> (i32, i32) {
    %c0_i32 = arith.constant 0 : i32
    %c0_i32_0 = arith.constant 0 : i32
    %c0_i32_1 = arith.constant 0 : i32
    return %c0_i32, %c0_i32_0 : i32, i32
  }
  func.func @transform_6(%arg0: i32) -> (i32, i32) {
    %c0_i32 = arith.constant 0 : i32
    %c0_i32_0 = arith.constant 0 : i32
    %c0_i32_1 = arith.constant 0 : i32
    return %c0_i32, %c0_i32_0 : i32, i32
  }
  func.func @transform_7(%arg0: i32) -> (i32, i32) {
    %c0_i32 = arith.constant 0 : i32
    %c0_i32_0 = arith.constant 0 : i32
    %c0_i32_1 = arith.constant 0 : i32
    return %c0_i32, %c0_i32_0 : i32, i32
  }
  func.func @transform_8(%arg0: i32) -> (i32, i32) {
    %c0_i32 = arith.constant 0 : i32
    %c0_i32_0 = arith.constant 0 : i32
    %c0_i32_1 = arith.constant 0 : i32
    return %c0_i32, %c0_i32_0 : i32, i32
  }
  func.func @transform_9(%arg0: i32) -> (i32, i32) {
    %c0_i32 = arith.constant 0 : i32
    %c0_i32_0 = arith.constant 0 : i32
    %c0_i32_1 = arith.constant 0 : i32
    return %c0_i32, %c0_i32_0 : i32, i32
  }
  func.func @transform_10(%arg0: i32) -> (i32, i32) {
    %c0_i32 = arith.constant 0 : i32
    %c0_i32_0 = arith.constant 0 : i32
    %c0_i32_1 = arith.constant 0 : i32
    return %c0_i32, %c0_i32_0 : i32, i32
  }
  func.func @transform_11(%arg0: i32) -> (i32, i32) {
    %c0_i32 = arith.constant 0 : i32
    %c0_i32_0 = arith.constant 0 : i32
    %c0_i32_1 = arith.constant 0 : i32
    return %c0_i32, %c0_i32_0 : i32, i32
  }
  func.func @transform_12(%arg0: i32) -> (i32, i32) {
    %c0_i32 = arith.constant 0 : i32
    %c0_i32_0 = arith.constant 0 : i32
    %c0_i32_1 = arith.constant 0 : i32
    return %c0_i32, %c0_i32_0 : i32, i32
  }
  func.func @transform_13(%arg0: i32) -> (i32, i32) {
    %c0_i32 = arith.constant 0 : i32
    %c0_i32_0 = arith.constant 0 : i32
    %c0_i32_1 = arith.constant 0 : i32
    return %c0_i32, %c0_i32_0 : i32, i32
  }
  func.func @transform_14(%arg0: i32) -> (i32, i32) {
    %c0_i32 = arith.constant 0 : i32
    %c0_i32_0 = arith.constant 0 : i32
    return %arg0, %c0_i32 : i32, i32
  }
  func.func @transform_15(%arg0: i32) -> (i32, i32) {
    %c0_i32 = arith.constant 0 : i32
    %c0_i32_0 = arith.constant 0 : i32
    return %arg0, %c0_i32 : i32, i32
  }
}

</mosaic_0001>

<bundles_post_ra>
// kernel: vae_forward.1
= control target key start
LH: loop header
LB: loop body
LE: loop exit
PB: predicated region body
PF: predicated region fallthrough
CT: control target
= control target key end

     0   :  { %21 = vsyncpa [#allocation3], 0  ;;  %s4284_s0 = inlined_call_operand.vmem [shape: bf16[256,256], index: 0, kind: input, shape index: {}]   ;;  %s4285_s1 = inlined_call_operand.vmem [shape: bf16[256,64], index: 1, kind: input, shape index: {}]   ;;  %s4286_s2 = inlined_call_operand.vmem [shape: bf16[256,128], index: 2, kind: input, shape index: {}]   ;;  %s4287_s3 = inlined_call_operand.vmem [shape: f32[1,128], index: 3, kind: input, shape index: {}]   ;;  %s4288_s4 = inlined_call_operand.vmem [shape: bf16[128,128], index: 4, kind: input, shape index: {}]   ;;  %s4289_s5 = inlined_call_operand.vmem [shape: f32[1,128], index: 5, kind: input, shape index: {}]   ;;  %s4290_s6 = inlined_call_operand.vmem [shape: bf16[128,128], index: 6, kind: input, shape index: {}]   ;;  %s4291_s7 = inlined_call_operand.vmem [shape: f32[1,128], index: 7, kind: input, shape index: {}]   ;;  %s4292_s8 = inlined_call_operand.vmem [shape: bf16[128,128], index: 8, kind: input, shape index: {}]   ;;  %s4293_s9 = inlined_call_operand.vmem [shape: f32[1,128], index: 9, kind: input, shape index: {}]   ;;  %s4294_s10 = inlined_call_operand.vmem [shape: bf16[128,128], index: 10, kind: input, shape index: {}]   ;;  %s4295_s11 = inlined_call_operand.vmem [shape: f32[1,128], index: 11, kind: input, shape index: {}]   ;;  %s4296_s12 = inlined_call_operand.vmem [shape: bf16[128,256], index: 12, kind: input, shape index: {}]   ;;  %s4297_s13 = inlined_call_operand.vmem [shape: f32[1,256], index: 13, kind: input, shape index: {}]   ;;  %s4298_s14 = inlined_call_operand.hbm [shape: bf16[256,256], index: 14, kind: output, shape index: {0}]   ;;  %s4299_s15 = inlined_call_operand.vmem [shape: f32[256,128], index: 15, kind: output, shape index: {1}]  }
   0x1   :  { %23 = vsyncpa [#allocation3 + $0x1], 0  ;;  %s3618_s18 = smov 0   ;;  %s3620_s19 = smov 0  }
   0x2   :  { %s3622_s20 = smov 0   ;;  %s3624_s21 = smov 0  }
   0x3 LB: > { %4305 = sst [smem:[#allocation5_spill]] %s3519_s18  ;;  %s3639_s22 = sadd.s32 4294967295, %s3531_s21   ;;  %s3531_s21 = sphi %s3624_s21, %s4316_s21   ;;  %s3527_s20 = sphi %s3622_s20, %s4318_s20   ;;  %s3523_s19 = sphi %s3620_s19, %s4320_s19   ;;  %s3519_s18 = sphi %s3618_s18, %s4319_s18  }
   0x4   : > { %4306 = sst [smem:[#allocation6_spill]] %s3527_s20  ;;  %s2657_s23 = sadd.s32 4294967294, %s3531_s21  }
   0x5   : > { %s3643_s24 = sadd.s32 1, %s3531_s21   ;;  %s340_s25 = sadd.s32 1, %s3527_s20 }
   0x6   : > { %4307 = sst [smem:[#allocation7_spill]] %s3643_s24  ;;  %s337_s26 = ssub.s32 %s3531_s21, %s3643_s24 }
   0x7   : > { %p350_p0 = scmp.ne.s32.totalorder %s3527_s20, %s3523_s19  ;;  %p338_p1 = scmp.eq.s32.totalorder %s337_s26, 0 }
   0x8   : > { %p351_p2 = scmp.eq.s32.totalorder %s3639_s22, 1  ;;  %p356_p3 = scmp.ne.s32.totalorder %s3523_s19, %s3519_s18 }
   0x9   : > { %p357_p4 = scmp.eq.s32.totalorder %s2657_s23, 1  ;;  %p2660_p7 = scmp.ge.s32.totalorder %s3531_s21, 1 }
   0xa   : > { %s3654_s27 = scalar_select %p338_p1, %s3527_s20, %s340_s25  }
   0xb   : > { %p3656_p5 = por %p351_p2, %p350_p0  ;;  %p3660_p6 = por %p357_p4, %p356_p3 }
   0xc   : > { %4308 = sst [smem:[#allocation8_spill]] %s3654_s27  ;;  %p456_p8 = scmp.lt.s32.totalorder %s3531_s21, 3 }
   0xd   : > { %s4310_s29 = scalar_select %p3660_p6, 1, 0 }
   0xe   : > { %p457_p9 = pnand %p2660_p7, %p456_p8 }
   0xf   : > { %4311 = sst [smem:[#allocation9_spill]] %s4310_s29  ;;  %v3213_v0 = vld [vmem:[%s4286_s2 + $0x40] sm:$0xff] (!%p457_p9)   ;;  %s2662_s17 = sshll.u32 (!%p457_p9), %s3639_s22, 4  ;;  %v3215_v2 = vld [vmem:[%s4286_s2 + $0x48] sm:$0xff] (!%p457_p9)   ;;  %v3217_v4 = vld [vmem:[%s4286_s2 + $0x50] sm:$0xff] (!%p457_p9)  }
  0x10   : > { %460 = sbr.rel (%p457_p9) target bundleno = 1626 (0x65a), region = 76  ;;  %v3214_v1 = vld [vmem:[%s4286_s2] sm:$0xff] (!%p457_p9)   ;;  %2858 = vmatprep.subr.bf16.mxu0 (!%p457_p9), %v3213_v0  ;;  %3114 = vmatprep.subr.bf16.mxu1 (!%p457_p9), %v3213_v0  ;;  %v3216_v3 = vld [vmem:[%s4286_s2 + $0x8] sm:$0xff] (!%p457_p9)   ;;  %p516_p10 = scmp.lt.s32.totalorder (!%p457_p9), %s2662_s17, 31  ;;  %v3218_v5 = vld [vmem:[%s4286_s2 + $0x10] sm:$0xff] (!%p457_p9)  }
  0x11   : > { %2859 = vmatpush3.bf16.msra.mxu0 (!%p457_p9), %v3214_v1  ;;  %3122 = vmatpush3.bf16.msra.mxu1 (!%p457_p9), %v3214_v1  ;;  %v3219_v6 = vld [vmem:[%s4286_s2 + $0x58] sm:$0xff] (!%p457_p9)   ;;  %v3221_v8 = vld [vmem:[%s4286_s2 + $0x60] sm:$0xff] (!%p457_p9)   ;;  %v3223_v10 = vld [vmem:[%s4286_s2 + $0x68] sm:$0xff] (!%p457_p9)   ;;  %s3533_s24 = smov (!%p457_p9), 64   ;;  %s505_s23 = sand.u32 (!%p457_p9), 1, %s3523_s19  }
  0x12   : > { %2860 = vmatprep.subr.bf16.mxu0 (!%p457_p9), %v3215_v2  ;;  %3115 = vmatprep.subr.bf16.mxu1 (!%p457_p9), %v3215_v2  ;;  %v3220_v7 = vld [vmem:[%s4286_s2 + $0x18] sm:$0xff] (!%p457_p9)   ;;  %v3222_v9 = vld [vmem:[%s4286_s2 + $0x20] sm:$0xff] (!%p457_p9)   ;;  %v3224_v12 = vld [vmem:[%s4286_s2 + $0x28] sm:$0xff] (!%p457_p9)   ;;  %s2661_s25 = sshll.u32 (!%p457_p9), %s505_s23, 7  ;;  %s3535_s16 = smov (!%p457_p9), [#allocation2]  }
  0x13   : > { %v3225_v13 = vld [vmem:[%s4286_s2 + $0x70] sm:$0xff] (!%p457_p9)   ;;  %v3227_v16 = vld [vmem:[%s4286_s2 + $0x78] sm:$0xff] (!%p457_p9)   ;;  %v3253_v21 = vld [vmem:[%s4288_s4] sm:$0xff] (!%p457_p9)  }
  0x14   : > { %v3226_v15 = vld [vmem:[%s4286_s2 + $0x30] sm:$0xff] (!%p457_p9)   ;;  %v3228_v17 = vld [vmem:[%s4286_s2 + $0x38] sm:$0xff] (!%p457_p9)   ;;  %v3254_v23 = vld [vmem:[%s4288_s4 + $0x8] sm:$0xff] (!%p457_p9)  }
  0x15   : > { %2861 = vmatpush3.bf16.msra.mxu0 (!%p457_p9), %v3216_v3  ;;  %3123 = vmatpush3.bf16.msra.mxu1 (!%p457_p9), %v3216_v3  ;;  %v3255_v24 = vld [vmem:[%s4288_s4 + $0x10] sm:$0xff] (!%p457_p9)   ;;  %v3256_v35 = vld [vmem:[%s4288_s4 + $0x18] sm:$0xff] (!%p457_p9)   ;;  %v3257_v36 = vld [vmem:[%s4288_s4 + $0x20] sm:$0xff] (!%p457_p9)  }
  0x16   : > { %2862 = vmatprep.subr.bf16.mxu0 (!%p457_p9), %v3217_v4  ;;  %3116 = vmatprep.subr.bf16.mxu1 (!%p457_p9), %v3217_v4  ;;  %v3258_v37 = vld [vmem:[%s4288_s4 + $0x28] sm:$0xff] (!%p457_p9)   ;;  %v3259_v38 = vld [vmem:[%s4288_s4 + $0x30] sm:$0xff] (!%p457_p9)   ;;  %v3260_v39 = vld [vmem:[%s4288_s4 + $0x38] sm:$0xff] (!%p457_p9)  }
  0x17   : > { %s4322_s17 = smov (!%p516_p10, %s2662_s17), 31  ;;  %v3768_v40 = vld [vmem:[%s4290_s6] sm:$0xff]  }
  0x18   : > { %s2800_s30 = sshll.u32 %s4322_s17, 3  ;;  %v3774_v42 = vld [vmem:[%s4287_s3] ss:$0 sm:$0xff]  ;;  %s2666_s29 = sshll.u32 %s4322_s17, 2 }
  0x19   : > { %2863 = vmatpush3.bf16.msra.mxu0 %v3218_v5  ;;  %3124 = vmatpush3.bf16.msra.mxu1 %v3218_v5  ;;  %s3702_s20 = scalar_lea.vmem %s4284_s0, %s2800_s30  ;;  %s526_s18 = scalar_lea.vmem %s4285_s1, %s2666_s29 }
  0x1a   : > { %2864 = vmatprep.subr.bf16.mxu0 %v3219_v6  ;;  %3117 = vmatprep.subr.bf16.mxu1 %v3219_v6  ;;  %v3231_v11 = vld [vmem:[%s3702_s20 + $0x4] ss:$8 sps:$4 sm:$0xff]   ;;  %v3229_v18 = vld [vmem:[%s3702_s20] ss:$8 sps:$4 sm:$0xff]   ;;  %v3232_v19 = vld [vmem:[%s3702_s20 + $0x14] ss:$8 sps:$4 sm:$0xff]   ;;  %s3894_s26 = scalar_lea.vmem %s4299_s15, %s2800_s30 }
  0x1b   : > { %799 = vmatprep.mubr.bf16.mxu0 %v3231_v11  ;;  %v3239_v14 = vld [vmem:[%s3702_s20 + $0x44] ss:$8 sps:$4 sm:$0xff]   ;;  %v3237_v20 = vld [vmem:[%s3702_s20 + $0x40] ss:$8 sps:$4 sm:$0xff]   ;;  %v3243_v22 = vld [vmem:[%s3702_s20 + $0x54] ss:$8 sps:$4 sm:$0xff]  }
  0x1c   : > { %831 = vmatprep.mubr.bf16.mxu1 %v3239_v14  ;;  %v3234_v25 = vld [vmem:[%s3702_s20 + $0x10] ss:$8 sps:$4 sm:$0xff]   ;;  %v3235_v26 = vld [vmem:[%s3702_s20 + $0x24] ss:$8 sps:$4 sm:$0xff]   ;;  %v3240_v29 = vld [vmem:[%s3702_s20 + $0x20] ss:$8 sps:$4 sm:$0xff]  }
  0x1d   : > { %2865 = vmatpush3.bf16.msra.mxu0 %v3220_v7  ;;  %3125 = vmatpush3.bf16.msra.mxu1 %v3220_v7  ;;  %v3246_v27 = vld [vmem:[%s3702_s20 + $0x50] ss:$8 sps:$4 sm:$0xff]   ;;  %v3247_v28 = vld [vmem:[%s3702_s20 + $0x64] ss:$8 sps:$4 sm:$0xff]   ;;  %v3241_v30 = vld [vmem:[%s3702_s20 + $0x34] ss:$8 sps:$4 sm:$0xff]  }
  0x1e   : > { %2866 = vmatprep.subr.bf16.mxu0 %v3221_v8  ;;  %3118 = vmatprep.subr.bf16.mxu1 %v3221_v8  ;;  %v3249_v31 = vld [vmem:[%s3702_s20 + $0x60] ss:$8 sps:$4 sm:$0xff]   ;;  %v3250_v32 = vld [vmem:[%s3702_s20 + $0x74] ss:$8 sps:$4 sm:$0xff]   ;;  %v3245_v33 = vld [vmem:[%s3702_s20 + $0x30] ss:$8 sps:$4 sm:$0xff]  }
  0x1f   : > { %v3252_v34 = vld [vmem:[%s3702_s20 + $0x70] ss:$8 sps:$4 sm:$0xff]   ;;  %s3473_s29 = sshll.u32 %s3535_s16, 4  ;;  %s3474_s29 = int_to_ptr.vmem [resolvable:$false] %s3473_s29 }
  0x21   : > { %2867 = vmatpush3.bf16.msra.mxu0 %v3222_v9  ;;  %3126 = vmatpush3.bf16.msra.mxu1 %v3222_v9 }
  0x22   : > { %2868 = vmatprep.subr.bf16.mxu0 %v3223_v10  ;;  %3119 = vmatprep.subr.bf16.mxu1 %v3223_v10 }
  0x25   : > { %2869 = vmatpush3.bf16.msra.mxu0 %v3224_v12  ;;  %3127 = vmatpush3.bf16.msra.mxu1 %v3224_v12 }
  0x26   : > { %2870 = vmatprep.subr.bf16.mxu0 %v3225_v13  ;;  %3120 = vmatprep.subr.bf16.mxu1 %v3225_v13 }
  0x29   : > { %2871 = vmatpush3.bf16.msra.mxu0 %v3226_v15  ;;  %3128 = vmatpush3.bf16.msra.mxu1 %v3226_v15 }
  0x2a   : > { %2872 = vmatprep.subr.bf16.mxu0 %v3227_v16  ;;  %3121 = vmatprep.subr.bf16.mxu1 %v3227_v16 }
  0x2d   : > { %2873 = vmatpush3.bf16.msra.mxu0 %v3228_v17  ;;  %3129 = vmatpush3.bf16.msra.mxu1 %v3228_v17 }
  0x2e   : > { %2986 = vmatprep.subr.bf16.mxu1 %v3253_v21 }
  0x30   : > { %800 = vmatmul.mubr.bf16.vlgmr.msra.gmra.mrb[0].mxu0 %v3229_v18  ;;  %832 = vmatmul.mubr.bf16.vlgmr.msra.gmra.mrb[0].mxu1 %v3237_v20 }
  0x31   : > { %807 = vmatprep.mubr.bf16.mxu0 %v3232_v19  ;;  %839 = vmatprep.mubr.bf16.mxu1 %v3243_v22 }
  0x32   : > { %2987 = vmatpush3.bf16.msra.mxu1 %v3253_v21 }
  0x33   : > { %2988 = vmatprep.subr.bf16.mxu1 %v3254_v23 }
  0x36   : > { %2989 = vmatpush3.bf16.msra.mxu1 %v3254_v23 }
  0x37   : > { %2990 = vmatprep.subr.bf16.mxu1 %v3255_v24 }
  0x38   : > { %808 = vmatmul.mubr.bf16.gmra.mrb[4].mxu0 %v3234_v25  ;;  %840 = vmatmul.mubr.bf16.gmra.mrb[4].mxu1 %v3246_v27 }
  0x39   : > { %815 = vmatprep.mubr.bf16.mxu0 %v3235_v26  ;;  %847 = vmatprep.mubr.bf16.mxu1 %v3247_v28 }
  0x3a   : > { %2991 = vmatpush3.bf16.msra.mxu1 %v3255_v24 }
  0x3b   : > { %2992 = vmatprep.subr.bf16.mxu1 %v3256_v35 }
  0x3e   : > { %2993 = vmatpush3.bf16.msra.mxu1 %v3256_v35 }
  0x3f   : > { %2994 = vmatprep.subr.bf16.mxu1 %v3257_v36 }
  0x40   : > { %816 = vmatmul.mubr.bf16.gmra.mrb[8].mxu0 %v3240_v29  ;;  %848 = vmatmul.mubr.bf16.gmra.mrb[8].mxu1 %v3249_v31 }
  0x41   : > { %823 = vmatprep.mubr.bf16.mxu0 %v3241_v30  ;;  %855 = vmatprep.mubr.bf16.mxu1 %v3250_v32 }
  0x42   : > { %2995 = vmatpush3.bf16.msra.mxu1 %v3257_v36 }
  0x43   : > { %2996 = vmatprep.subr.bf16.mxu1 %v3258_v37 }
  0x46   : > { %2997 = vmatpush3.bf16.msra.mxu1 %v3258_v37 }
  0x47   : > { %2998 = vmatprep.subr.bf16.mxu1 %v3259_v38 }
  0x48   : > { %824 = vmatmul.mubr.bf16.gmra.mrb[12].mxu0 %v3245_v33  ;;  %856 = vmatmul.mubr.bf16.gmra.mrb[12].mxu1 %v3252_v34 }
  0x4a   : > { %2999 = vmatpush3.bf16.msra.mxu1 %v3259_v38  ;;  %v3262_v38 = vld [vmem:[%s4290_s6 + $0x8] sm:$0xff]  }
  0x4b   : > { %3000 = vmatprep.subr.bf16.mxu1 %v3260_v39 }
  0x4e   : > { %3001 = vmatpush3.bf16.msra.mxu1 %v3260_v39 }
  0x4f   : > { %3018 = vmatprep.subr.bf16.mxu1 %v3768_v40 }
 0x103   : > { %v2874_v41 = vpop.f32.mrb[0].mxu0  ;;  %v2898_v44 = vpop.f32.mrb[0].mxu1 }
 0x104   : > { %v2875_v43 = vpop.f32.mrb[1].mxu0  ;;  %v2899_v47 = vpop.f32.mrb[1].mxu1 }
 0x105   : > { %v2876_v45 = vadd.f32 %v2875_v43, %v2874_v41  ;;  %v2877_v46 = vpop.f32.mrb[2].mxu0  ;;  %v2900_v49 = vadd.f32 %v2899_v47, %v2898_v44  ;;  %v2901_v50 = vpop.f32.mrb[2].mxu1 }
 0x106   : > { %v2878_v48 = vpop.f32.mrb[3].mxu0  ;;  %v2902_v53 = vpop.f32.mrb[3].mxu1 }
 0x107   : > { %v802_v51 = vadd.f32 %v2876_v45, %v3774_v42  ;;  %v2879_v52 = vadd.f32 %v2878_v48, %v2877_v46  ;;  %v834_v54 = vadd.f32 %v2900_v49, %v3774_v42  ;;  %v2903_v55 = vadd.f32 %v2902_v53, %v2901_v50 }
 0x109   : > { %v880_v56 = vmul.f32 0.2, %v802_v51  ;;  %v805_v57 = vadd.f32 %v2879_v52, %v3774_v42  ;;  %vm864_vm0 = vcmp.gt.f32.partialorder %v802_v51, 0.0  ;;  %vm872_vm1 = vcmp.gt.f32.partialorder %v834_v54, 0.0 }
 0x10a   : > { %v888_v58 = vmul.f32 0.2, %v834_v54  ;;  %v837_v59 = vadd.f32 %v2903_v55, %v3774_v42 }
 0x10b   : > { %vm865_vm2 = vcmp.gt.f32.partialorder %v805_v57, 0.0  ;;  %v881_v60 = vmul.f32 0.2, %v805_v57  ;;  %v2880_v61 = vpop.f32.mrb[4].mxu0  ;;  %v2904_v0 = vpop.f32.mrb[4].mxu1  ;;  %v896_v4 = vsel %vm864_vm0, %v802_v51, %v880_v56  ;;  %v3263_v51 = vld [vmem:[%s4290_s6 + $0x10] sm:$0xff]  }
 0x10c   : > { %v2881_v62 = vpop.f32.mrb[5].mxu0  ;;  %vm873_vm3 = vcmp.gt.f32.partialorder %v837_v59, 0.0  ;;  %v889_v63 = vmul.f32 0.2, %v837_v59  ;;  %v3780_v1 = vsel %vm872_vm1, %v834_v54, %v888_v58  ;;  %v2905_v6 = vpop.f32.mrb[5].mxu1 }
 0x10d   : > { %v2882_v2 = vadd.f32 %v2881_v62, %v2880_v61  ;;  %v2883_v3 = vpop.f32.mrb[6].mxu0  ;;  %v897_v5 = vsel %vm865_vm2, %v805_v57, %v881_v60  ;;  %v2906_v9 = vadd.f32 %v2905_v6, %v2904_v0  ;;  %v2907_v10 = vpop.f32.mrb[6].mxu1 }
 0x10e   : > { %v2884_v7 = vpop.f32.mrb[7].mxu0  ;;  %v928_v8 = vpack.c.bf16 %v897_v5, %v896_v4  ;;  %v3782_v11 = vsel %vm873_vm3, %v837_v59, %v889_v63  ;;  %v2908_v14 = vpop.f32.mrb[7].mxu1  ;;  %v3264_v4 = vld [vmem:[%s4290_s6 + $0x18] sm:$0xff]  }
 0x10f   : > { %v810_v12 = vadd.f32 %v2882_v2, %v3774_v42  ;;  %v2885_v13 = vadd.f32 %v2884_v7, %v2883_v3  ;;  %v932_v15 = vpack.c.bf16 %v3782_v11, %v3780_v1  ;;  %v842_v16 = vadd.f32 %v2906_v9, %v3774_v42  ;;  %v3268_v1 = vld [vmem:[%s4290_s6 + $0x38] sm:$0xff]   ;;  %v2820_v11 = vld [vmem:[%s526_s18] sm:$0xff]  }
 0x110   : > { %3002 = vmatprep.mubr.bf16.mxu1 %v928_v8  ;;  %v2909_v17 = vadd.f32 %v2908_v14, %v2907_v10 }
 0x111   : > { %v882_v18 = vmul.f32 0.2, %v810_v12  ;;  %v813_v19 = vadd.f32 %v2885_v13, %v3774_v42  ;;  %vm866_vm4 = vcmp.gt.f32.partialorder %v810_v12, 0.0  ;;  %vm874_vm5 = vcmp.gt.f32.partialorder %v842_v16, 0.0 }
 0x112   : > { %v890_v20 = vmul.f32 0.2, %v842_v16  ;;  %v845_v21 = vadd.f32 %v2909_v17, %v3774_v42  ;;  %v3265_v17 = vld [vmem:[%s4290_s6 + $0x20] sm:$0xff]  }
 0x113   : > { %vm867_vm6 = vcmp.gt.f32.partialorder %v813_v19, 0.0  ;;  %v883_v22 = vmul.f32 0.2, %v813_v19  ;;  %v2886_v23 = vpop.f32.mrb[8].mxu0  ;;  %v2910_v26 = vpop.f32.mrb[8].mxu1  ;;  %v898_v28 = vsel %vm866_vm4, %v810_v12, %v882_v18 }
 0x114   : > { %v2887_v24 = vpop.f32.mrb[9].mxu0  ;;  %vm875_vm7 = vcmp.gt.f32.partialorder %v845_v21, 0.0  ;;  %v891_v25 = vmul.f32 0.2, %v845_v21  ;;  %v3790_v27 = vsel %vm874_vm5, %v842_v16, %v890_v20  ;;  %v2911_v32 = vpop.f32.mrb[9].mxu1 }
 0x115   : > { %v899_v29 = vsel %vm867_vm6, %v813_v19, %v883_v22  ;;  %v2888_v30 = vadd.f32 %v2887_v24, %v2886_v23  ;;  %v2889_v31 = vpop.f32.mrb[10].mxu0  ;;  %v2912_v35 = vadd.f32 %v2911_v32, %v2910_v26  ;;  %v2913_v36 = vpop.f32.mrb[10].mxu1  ;;  %v3267_v26 = vld [vmem:[%s4290_s6 + $0x30] sm:$0xff]   ;;  %v2853_v32 = vld [vmem:[%s526_s18 + $0x18] sm:$0xff]  }
 0x116   : > { %v929_v33 = vpack.c.bf16 %v899_v29, %v898_v28  ;;  %v2890_v34 = vpop.f32.mrb[11].mxu0  ;;  %v3792_v37 = vsel %vm875_vm7, %v845_v21, %v891_v25  ;;  %v2914_v43 = vpop.f32.mrb[11].mxu1  ;;  %v2821_v28 = vunpack.c.l.bf16 %v2820_v11  ;;  %v2822_v29 = vunpack.c.h.bf16 %v2820_v11 }
 0x117   : > { %v818_v39 = vadd.f32 %v2888_v30, %v3774_v42  ;;  %v2891_v41 = vadd.f32 %v2890_v34, %v2889_v31  ;;  %v933_v44 = vpack.c.bf16 %v3792_v37, %v3790_v27  ;;  %v850_v45 = vadd.f32 %v2912_v35, %v3774_v42  ;;  %v2852_v27 = vld [vmem:[%s526_s18 + $0x10] sm:$0xff]   ;;  %v2854_v37 = vld [vmem:[%s526_s18 + $0x20] sm:$0xff]  }
 0x118   : > { %3003 = vmatmul.mubr.bf16.vlgmr.msra.gmra.mrb[16].mxu1 %v929_v33  ;;  %v2915_v46 = vadd.f32 %v2914_v43, %v2913_v36  ;;  %v2829_v33 = vunpack.c.l.bf16 %v2852_v27  ;;  %v2830_v34 = vunpack.c.h.bf16 %v2852_v27  ;;  %v2833_v35 = vunpack.c.l.bf16 %v2853_v32 }
 0x119   : > { %v884_v47 = vmul.f32 0.2, %v818_v39  ;;  %v821_v48 = vadd.f32 %v2891_v41, %v3774_v42  ;;  %3019 = vmatpush3.bf16.msra.mxu1 %v3768_v40  ;;  %vm868_vm8 = vcmp.gt.f32.partialorder %v818_v39, 0.0  ;;  %vm876_vm9 = vcmp.gt.f32.partialorder %v850_v45, 0.0 }
 0x11a   : > { %v892_v49 = vmul.f32 0.2, %v850_v45  ;;  %v853_v50 = vadd.f32 %v2915_v46, %v3774_v42  ;;  %3020 = vmatprep.subr.bf16.mxu1 %v3262_v38  ;;  %v2834_v36 = vunpack.c.h.bf16 %v2853_v32  ;;  %v3183_v41 = vpack.i.bf16 %v2830_v34, %v2829_v33 }
 0x11b   : > { %vm869_vm10 = vcmp.gt.f32.partialorder %v821_v48, 0.0  ;;  %v885_v52 = vmul.f32 0.2, %v821_v48  ;;  %v2892_v53 = vpop.f32.mrb[12].mxu0  ;;  %v2916_v56 = vpop.f32.mrb[12].mxu1  ;;  %v900_v59 = vsel %vm868_vm8, %v818_v39, %v884_v47  ;;  %v2855_v39 = vld [vmem:[%s526_s18 + $0x28] sm:$0xff]  }
 0x11c   : > { %v2893_v54 = vpop.f32.mrb[13].mxu0  ;;  %vm877_vm11 = vcmp.gt.f32.partialorder %v853_v50, 0.0  ;;  %v893_v55 = vmul.f32 0.2, %v853_v50  ;;  %v908_v57 = vsel %vm876_vm9, %v850_v45, %v892_v49  ;;  %v2917_v61 = vpop.f32.mrb[13].mxu1  ;;  %v2838_v45 = vunpack.c.h.bf16 %v2854_v37  ;;  %3184 = vrot.lane.b32.xlu1 %v3183_v41, %s3533_s24  ;;  %v2856_v49 = vld [vmem:[%s526_s18 + $0x30] sm:$0xff]  }
 0x11d   : > { %v2894_v58 = vadd.f32 %v2893_v54, %v2892_v53  ;;  %v2895_v40 = vpop.f32.mrb[14].mxu0  ;;  %v901_v60 = vsel %vm869_vm10, %v821_v48, %v885_v52  ;;  %3021 = vmatpush3.bf16.msra.mxu1 %v3262_v38  ;;  %v2918_v0 = vadd.f32 %v2917_v61, %v2916_v56  ;;  %v2919_v2 = vpop.f32.mrb[14].mxu1  ;;  %v3173_v38 = vpack.i.bf16 %v2822_v29, %v2821_v28 }
 0x11e   : > { %v2896_v62 = vpop.f32.mrb[15].mxu0  ;;  %v930_v63 = vpack.c.bf16 %v901_v60, %v900_v59  ;;  %v909_v3 = vsel %vm877_vm11, %v853_v50, %v893_v55  ;;  %3022 = vmatprep.subr.bf16.mxu1 %v3263_v51  ;;  %v2920_v7 = vpop.f32.mrb[15].mxu1  ;;  %v3188_v46 = vpack.i.bf16 %v2834_v36, %v2833_v35  ;;  %v2841_v47 = vunpack.c.l.bf16 %v2855_v39  ;;  %v2857_v50 = vld [vmem:[%s526_s18 + $0x38] sm:$0xff]  }
 0x11f   : > { %v826_v5 = vadd.f32 %v2894_v58, %v3774_v42  ;;  %v2897_v6 = vadd.f32 %v2896_v62, %v2895_v40  ;;  %v934_v8 = vpack.c.bf16 %v909_v3, %v908_v57  ;;  %v858_v9 = vadd.f32 %v2918_v0, %v3774_v42  ;;  %3174 = vrot.lane.b32.xlu0 %v3173_v38, %s3533_s24  ;;  %v3848_v40 = vld [vmem:[%s4289_s5] ss:$0 sm:$0xff] }
 0x120   : > { %3006 = vmatprep.mubr.bf16.mxu1 %v930_v63  ;;  %v2921_v10 = vadd.f32 %v2920_v7, %v2919_v2  ;;  %v2842_v48 = vunpack.c.h.bf16 %v2855_v39  ;;  %v2845_v52 = vunpack.c.l.bf16 %v2856_v49  ;;  %v2846_v53 = vunpack.c.h.bf16 %v2856_v49  ;;  %3189 = vrot.lane.b32.xlu1 %v3188_v46, %s3533_s24 }
 0x121   : > { %v886_v12 = vmul.f32 0.2, %v826_v5  ;;  %v829_v13 = vadd.f32 %v2897_v6, %v3774_v42  ;;  %3023 = vmatpush3.bf16.msra.mxu1 %v3263_v51  ;;  %vm870_vm12 = vcmp.gt.f32.partialorder %v826_v5, 0.0  ;;  %vm878_vm13 = vcmp.gt.f32.partialorder %v858_v9, 0.0 }
 0x122   : > { %v894_v14 = vmul.f32 0.2, %v858_v9  ;;  %v861_v16 = vadd.f32 %v2921_v10, %v3774_v42  ;;  %3024 = vmatprep.subr.bf16.mxu1 %v3264_v4  ;;  %v3266_v42 = vld [vmem:[%s4290_s6 + $0x28] sm:$0xff]   ;;  %v3198_v54 = vpack.i.bf16 %v2842_v48, %v2841_v47  ;;  %v2849_v55 = vunpack.c.l.bf16 %v2857_v50 }
 0x123   : > { %vm871_vm14 = vcmp.gt.f32.partialorder %v829_v13, 0.0  ;;  %v887_v18 = vmul.f32 0.2, %v829_v13  ;;  %v902_v21 = vsel %vm870_vm12, %v826_v5, %v886_v12  ;;  %v2850_v56 = vunpack.c.h.bf16 %v2857_v50 }
 0x124   : > { %vm879_vm15 = vcmp.gt.f32.partialorder %v861_v16, 0.0  ;;  %v895_v19 = vmul.f32 0.2, %v861_v16  ;;  %v910_v20 = vsel %vm878_vm13, %v858_v9, %v894_v14  ;;  %v3203_v57 = vpack.i.bf16 %v2846_v53, %v2845_v52  ;;  %3199 = vrot.lane.b32.xlu1 %v3198_v54, %s3533_s24 }
 0x125   : > { %v903_v22 = vsel %vm871_vm14, %v829_v13, %v887_v18  ;;  %3025 = vmatpush3.bf16.msra.mxu1 %v3264_v4  ;;  %v3208_v58 = vpack.i.bf16 %v2850_v56, %v2849_v55 }
 0x126   : > { %v931_v23 = vpack.c.bf16 %v903_v22, %v902_v21  ;;  %v911_v24 = vsel %vm879_vm15, %v861_v16, %v895_v19  ;;  %3026 = vmatprep.subr.bf16.mxu1 %v3265_v17 }
 0x127   : > { %v935_v25 = vpack.c.bf16 %v911_v24, %v910_v20 }
 0x128   : > { %3007 = vmatmul.mubr.bf16.gmra.mrb[20].mxu1 %v931_v23  ;;  %3209 = vrot.lane.b32.xlu1 %v3208_v58, %s3533_s24 }
 0x129   : > { %3010 = vmatprep.mubr.bf16.mxu1 %v932_v15  ;;  %3027 = vmatpush3.bf16.msra.mxu1 %v3265_v17  ;;  %v2851_v15 = vld [vmem:[%s526_s18 + $0x8] sm:$0xff]   ;;  %s2818_s18 = sshll.u32 %s3639_s22, 11  ;;  %s4243_s22 = scalar_lea.sflag [#allocation3], %s505_s23 }
 0x12a   : > { %3028 = vmatprep.subr.bf16.mxu1 %v3266_v42  ;;  %v2825_v30 = vunpack.c.l.bf16 %v2851_v15  ;;  %v2826_v31 = vunpack.c.h.bf16 %v2851_v15  ;;  %s4235_s17 = scalar_lea.hbm %s4298_s14, %s2818_s18 }
 0x12c   : > { %v3178_v43 = vpack.i.bf16 %v2826_v31, %v2825_v30 }
 0x12d   : > { %3029 = vmatpush3.bf16.msra.mxu1 %v3266_v42 }
 0x12e   : > { %3030 = vmatprep.subr.bf16.mxu1 %v3267_v26  ;;  %3179 = vrot.lane.b32.xlu0 %v3178_v43, %s3533_s24 }
 0x130   : > { %3011 = vmatmul.mubr.bf16.gmra.mrb[24].mxu1 %v933_v44  ;;  %v2837_v44 = vunpack.c.l.bf16 %v2854_v37 }
 0x131   : > { %3014 = vmatprep.mubr.bf16.mxu1 %v934_v8  ;;  %3031 = vmatpush3.bf16.msra.mxu1 %v3267_v26 }
 0x132   : > { %3032 = vmatprep.subr.bf16.mxu1 %v3268_v1  ;;  %v3193_v51 = vpack.i.bf16 %v2838_v45, %v2837_v44 }
 0x134   : > { %3194 = vrot.lane.b32.xlu0 %v3193_v51, %s3533_s24 }
 0x135   : > { %3033 = vmatpush3.bf16.msra.mxu1 %v3268_v1 }
 0x138   : > { %3015 = vmatmul.mubr.bf16.gmra.mrb[28].mxu1 %v935_v25  ;;  %3204 = vrot.lane.b32.xlu0 %v3203_v57, %s3533_s24 }
 0x1eb   : > { %v3004_v59 = vpop.f32.mrb[16].mxu1 }
 0x1ec   : > { %v1034_v60 = vadd.f32 %v3004_v59, %v3848_v40  ;;  %v1025_v61 = vpop.f32.mrb[17].mxu1 }
 0x1ed   : > { %v1026_v62 = vadd.f32 %v3848_v40, %v1025_v61  ;;  %v3005_v63 = vpop.f32.mrb[18].mxu1 }
 0x1ee   : > { %v1106_v0 = vmul.f32 0.2, %v1034_v60  ;;  %v1037_v2 = vadd.f32 %v3005_v63, %v3848_v40  ;;  %v1028_v3 = vpop.f32.mrb[19].mxu1  ;;  %vm1090_vm0 = vcmp.gt.f32.partialorder %v1034_v60, 0.0 }
 0x1ef   : > { %v1104_v4 = vmul.f32 0.2, %v1026_v62  ;;  %v1029_v5 = vadd.f32 %v3848_v40, %v1028_v3  ;;  %vm1088_vm1 = vcmp.gt.f32.partialorder %v1026_v62, 0.0 }
 0x1f0   : > { %vm1091_vm2 = vcmp.gt.f32.partialorder %v1037_v2, 0.0  ;;  %v1107_v6 = vmul.f32 0.2, %v1037_v2  ;;  %v1122_v8 = vsel %vm1090_vm0, %v1034_v60, %v1106_v0  ;;  %vm1568_vm0 = vcmask 523264  }
 0x1f1   : > { %vm1089_vm3 = vcmp.gt.f32.partialorder %v1029_v5, 0.0  ;;  %v1105_v7 = vmul.f32 0.2, %v1029_v5  ;;  %v1120_v12 = vsel %vm1088_vm1, %v1026_v62, %v1104_v4  ;;  %vm4034_vm1 = vmpackc.low %vm1568_vm0, %vm1568_vm0 }
 0x1f2   : > { %v1123_v9 = vsel %vm1091_vm2, %v1037_v2, %v1107_v6  ;;  %v3271_v6 = vld [vmem:[%s4292_s8 + $0x10] sm:$0xff]  }
 0x1f3   : > { %v1153_v10 = vpack.c.bf16 %v1123_v9, %v1122_v8  ;;  %v1121_v13 = vsel %vm1089_vm3, %v1029_v5, %v1105_v7  ;;  %v3269_v5 = vld [vmem:[%s4292_s8] sm:$0xff]   ;;  %v3272_v7 = vld [vmem:[%s4292_s8 + $0x18] sm:$0xff]   ;;  %v3274_v9 = vld [vmem:[%s4292_s8 + $0x28] sm:$0xff]  }
 0x1f4   : > { %v1152_v14 = vpack.c.bf16 %v1121_v13, %v1120_v12  ;;  %3050 = vmatprep.subr.bf16.mxu0 %v3269_v5  ;;  %v3273_v8 = vld [vmem:[%s4292_s8 + $0x20] sm:$0xff]  }
 0x1f5   : > { %3051 = vmatpush3.bf16.msra.mxu0 %v3269_v5 }
 0x1f6   : > { %3034 = vmatprep.mubr.bf16.mxu1 %v1152_v14 }
 0x1f7   : > { %3035 = vmatmul.mubr.bf16.vlgmr.msra.gmra.mrb[32].mxu1 %v1153_v10  ;;  %v3887_v10 = vld [vmem:[%s4291_s7] ss:$0 sm:$0xff] }
 0x1fb   : > { %v3008_v16 = vpop.f32.mrb[20].mxu1 }
 0x1fc   : > { %v1050_v17 = vadd.f32 %v3008_v16, %v3848_v40  ;;  %v1041_v18 = vpop.f32.mrb[21].mxu1 }
 0x1fd   : > { %v1042_v19 = vadd.f32 %v3848_v40, %v1041_v18  ;;  %v3009_v20 = vpop.f32.mrb[22].mxu1 }
 0x1fe   : > { %v1110_v21 = vmul.f32 0.2, %v1050_v17  ;;  %v1053_v22 = vadd.f32 %v3009_v20, %v3848_v40  ;;  %v1044_v23 = vpop.f32.mrb[23].mxu1  ;;  %vm1094_vm4 = vcmp.gt.f32.partialorder %v1050_v17, 0.0 }
 0x1ff   : > { %v1108_v24 = vmul.f32 0.2, %v1042_v19  ;;  %v1045_v42 = vadd.f32 %v3848_v40, %v1044_v23  ;;  %vm1092_vm5 = vcmp.gt.f32.partialorder %v1042_v19, 0.0 }
 0x200   : > { %vm1095_vm6 = vcmp.gt.f32.partialorder %v1053_v22, 0.0  ;;  %v1111_v25 = vmul.f32 0.2, %v1053_v22  ;;  %v1126_v1 = vsel %vm1094_vm4, %v1050_v17, %v1110_v21 }
 0x201   : > { %vm1093_vm7 = vcmp.gt.f32.partialorder %v1045_v42, 0.0  ;;  %v1109_v26 = vmul.f32 0.2, %v1045_v42  ;;  %v1124_v27 = vsel %vm1092_vm5, %v1042_v19, %v1108_v24 }
 0x202   : > { %v1127_v11 = vsel %vm1095_vm6, %v1053_v22, %v1111_v25 }
 0x203   : > { %v3012_v15 = vpop.f32.mrb[24].mxu1  ;;  %v1125_v28 = vsel %vm1093_vm7, %v1045_v42, %v1109_v26  ;;  %v1155_v29 = vpack.c.bf16 %v1127_v11, %v1126_v1  ;;  %v3275_v11 = vld [vmem:[%s4292_s8 + $0x30] sm:$0xff]  }
 0x204   : > { %v1066_v30 = vadd.f32 %v3012_v15, %v3848_v40  ;;  %v1057_v31 = vpop.f32.mrb[25].mxu1  ;;  %v1154_v32 = vpack.c.bf16 %v1125_v28, %v1124_v27  ;;  %v3175_v15 = vpop.permute.xlu0 %3174  ;;  %v3276_v27 = vld [vmem:[%s4292_s8 + $0x38] sm:$0xff]  }
 0x205   : > { %v1058_v33 = vadd.f32 %v3848_v40, %v1057_v31  ;;  %v3013_v34 = vpop.f32.mrb[26].mxu1  ;;  %v3176_v28 = vunpack.i.l.bf16 %v3175_v15  ;;  %v3177_v31 = vunpack.i.h.bf16 %v3175_v15 }
 0x206   : > { %vm1098_vm8 = vcmp.gt.f32.partialorder %v1066_v30, 0.0  ;;  %v1114_v35 = vmul.f32 0.2, %v1066_v30  ;;  %v1069_v36 = vadd.f32 %v3013_v34, %v3848_v40  ;;  %v1060_v37 = vpop.f32.mrb[27].mxu1  ;;  %3038 = vmatprep.mubr.bf16.mxu1 %v1154_v32 }
 0x207   : > { %v1112_v38 = vmul.f32 0.2, %v1058_v33  ;;  %v1061_v39 = vadd.f32 %v3848_v40, %v1060_v37  ;;  %3039 = vmatmul.mubr.bf16.gmra.mrb[36].mxu1 %v1155_v29  ;;  %vm1096_vm9 = vcmp.gt.f32.partialorder %v1058_v33, 0.0 }
 0x208   : > { %vm1099_vm10 = vcmp.gt.f32.partialorder %v1069_v36, 0.0  ;;  %v1115_v41 = vmul.f32 0.2, %v1069_v36  ;;  %v1130_v43 = vsel %vm1098_vm8, %v1066_v30, %v1114_v35  ;;  %v3180_v29 = vpop.permute.xlu0 %3179 }
 0x209   : > { %vm1097_vm11 = vcmp.gt.f32.partialorder %v1061_v39, 0.0  ;;  %v1113_v44 = vmul.f32 0.2, %v1061_v39  ;;  %v1128_v47 = vsel %vm1096_vm9, %v1058_v33, %v1112_v38 }
 0x20a   : > { %v1131_v45 = vsel %vm1099_vm10, %v1069_v36, %v1115_v41 }
 0x20b   : > { %v3016_v46 = vpop.f32.mrb[28].mxu1  ;;  %v1129_v48 = vsel %vm1097_vm11, %v1061_v39, %v1113_v44  ;;  %v1157_v49 = vpack.c.bf16 %v1131_v45, %v1130_v43  ;;  %v3181_v39 = vunpack.i.l.bf16 %v3180_v29 }
 0x20c   : > { %v1082_v50 = vadd.f32 %v3016_v46, %v3848_v40  ;;  %v1073_v51 = vpop.f32.mrb[29].mxu1  ;;  %v1156_v52 = vpack.c.bf16 %v1129_v48, %v1128_v47 }
 0x20d   : > { %v1074_v53 = vadd.f32 %v3848_v40, %v1073_v51  ;;  %v3017_v54 = vpop.f32.mrb[30].mxu1 }
 0x20e   : > { %vm1102_vm12 = vcmp.gt.f32.partialorder %v1082_v50, 0.0  ;;  %v1118_v55 = vmul.f32 0.2, %v1082_v50  ;;  %v1085_v56 = vadd.f32 %v3017_v54, %v3848_v40  ;;  %v1076_v57 = vpop.f32.mrb[31].mxu1  ;;  %3042 = vmatprep.mubr.bf16.mxu1 %v1156_v52 }
 0x20f   : > { %vm1100_vm13 = vcmp.gt.f32.partialorder %v1074_v53, 0.0  ;;  %v1116_v58 = vmul.f32 0.2, %v1074_v53  ;;  %v1077_v59 = vadd.f32 %v3848_v40, %v1076_v57  ;;  %3043 = vmatmul.mubr.bf16.gmra.mrb[40].mxu1 %v1157_v49  ;;  %v3270_v40 = vld [vmem:[%s4292_s8 + $0x8] sm:$0xff]   ;;  %v3182_v49 = vunpack.i.h.bf16 %v3180_v29 }
 0x210   : > { %vm1103_vm14 = vcmp.gt.f32.partialorder %v1085_v56, 0.0  ;;  %v1119_v60 = vmul.f32 0.2, %v1085_v56  ;;  %v1134_v61 = vsel %vm1102_vm12, %v1082_v50, %v1118_v55  ;;  %3052 = vmatprep.subr.bf16.mxu0 %v3270_v40 }
 0x211   : > { %vm1101_vm15 = vcmp.gt.f32.partialorder %v1077_v59, 0.0  ;;  %v1117_v62 = vmul.f32 0.2, %v1077_v59  ;;  %v1132_v63 = vsel %vm1100_vm13, %v1074_v53, %v1116_v58  ;;  %3053 = vmatpush3.bf16.msra.mxu0 %v3270_v40 }
 0x212   : > { %v1135_v0 = vsel %vm1103_vm14, %v1085_v56, %v1119_v60  ;;  %3054 = vmatprep.subr.bf16.mxu0 %v3271_v6 }
 0x213   : > { %v1133_v2 = vsel %vm1101_vm15, %v1077_v59, %v1117_v62  ;;  %v1159_v3 = vpack.c.bf16 %v1135_v0, %v1134_v61  ;;  %v3185_v0 = vpop.permute.xlu1 %3184 }
 0x214   : > { %v1158_v4 = vpack.c.bf16 %v1133_v2, %v1132_v63 }
 0x215   : > { %3055 = vmatpush3.bf16.msra.mxu0 %v3271_v6 }
 0x216   : > { %3046 = vmatprep.mubr.bf16.mxu1 %v1158_v4  ;;  %3056 = vmatprep.subr.bf16.mxu0 %v3272_v7 }
 0x217   : > { %3047 = vmatmul.mubr.bf16.gmra.mrb[44].mxu1 %v1159_v3 }
 0x219   : > { %3057 = vmatpush3.bf16.msra.mxu0 %v3272_v7 }
 0x21a   : > { %3058 = vmatprep.subr.bf16.mxu0 %v3273_v8 }
 0x21d   : > { %3059 = vmatpush3.bf16.msra.mxu0 %v3273_v8 }
 0x21e   : > { %3060 = vmatprep.subr.bf16.mxu0 %v3274_v9 }
 0x221   : > { %3061 = vmatpush3.bf16.msra.mxu0 %v3274_v9 }
 0x222   : > { %3062 = vmatprep.subr.bf16.mxu0 %v3275_v11 }
 0x225   : > { %3063 = vmatpush3.bf16.msra.mxu0 %v3275_v11 }
 0x226   : > { %3064 = vmatprep.subr.bf16.mxu0 %v3276_v27 }
 0x229   : > { %3065 = vmatpush3.bf16.msra.mxu0 %v3276_v27 }
 0x2ca   : > { %v3036_v12 = vpop.f32.mrb[32].mxu1 }
 0x2cb   : > { %v3897_v13 = vadd.f32 %v3036_v12, %v3887_v10  ;;  %v1249_v14 = vpop.f32.mrb[33].mxu1  ;;  %v3186_v12 = vunpack.i.l.bf16 %v3185_v0 }
 0x2cc   : > { %v3900_v16 = vadd.f32 %v3887_v10, %v1249_v14  ;;  %v3037_v17 = vpop.f32.mrb[34].mxu1 }
 0x2cd   : > { %1314 = vst [vmem:[%s3894_s26 + $0x10] sm:$0xff] %v3897_v13  ;;  %v1362_v18 = vmul.f32 0.5, %v3897_v13  ;;  %v3906_v19 = vadd.f32 %v3037_v17, %v3887_v10  ;;  %v1252_v20 = vpop.f32.mrb[35].mxu1 }
 0x2ce   : > { %1312 = vst [vmem:[%s3894_s26] sm:$0xff] %v3900_v16  ;;  %v1360_v21 = vmul.f32 0.5, %v3900_v16  ;;  %v3912_v22 = vadd.f32 %v3887_v10, %v1252_v20 }
 0x2cf   : > { %v1380_v23 = vmul.f32 1.442695, %v1362_v18  ;;  %1315 = vst [vmem:[%s3894_s26 + $0x18] sm:$0xff] %v3906_v19  ;;  %v1363_v24 = vmul.f32 0.5, %v3906_v19  ;;  %v3190_v18 = vpop.permute.xlu1 %3189 }
 0x2d0   : > { %v1376_v42 = vmul.f32 1.442695, %v1360_v21  ;;  %1313 = vst [vmem:[%s3894_s26 + $0x8] sm:$0xff] %v3912_v22  ;;  %v1361_v25 = vmul.f32 0.5, %v3912_v22  ;;  %v3187_v21 = vunpack.i.h.bf16 %v3185_v0  ;;  %v3191_v15 = vunpack.i.l.bf16 %v3190_v18 }
 0x2d1   : > { %v1382_v26 = vmul.f32 1.442695, %v1363_v24 }
 0x2d2   : > { %3309 = vpow2.f32 %v1376_v42  ;;  %v1378_v1 = vmul.f32 1.442695, %v1361_v25 }
 0x2d3   : > { %3311 = vpow2.f32 %v1380_v23 }
 0x2d4   : > { %3313 = vpow2.f32 %v1378_v1 }
 0x2d5   : > { %3315 = vpow2.f32 %v1382_v26 }
 0x2da   : > { %v3040_v30 = vpop.f32.mrb[36].mxu1 }
 0x2db   : > { %v3927_v32 = vadd.f32 %v3040_v30, %v3887_v10  ;;  %v1265_v33 = vpop.f32.mrb[37].mxu1 }
 0x2dc   : > { %v3310_v34 = vpop.eup %3309  ;;  %v3930_v35 = vadd.f32 %v3887_v10, %v1265_v33  ;;  %v3041_v36 = vpop.f32.mrb[38].mxu1 }
 0x2dd   : > { %v3312_v37 = vpop.eup %3311  ;;  %v1472_v38 = vmul.f32 %v3310_v34, %v3176_v28  ;;  %1318 = vst [vmem:[%s3894_s26 + $0x30] sm:$0xff] %v3927_v32  ;;  %v1366_v41 = vmul.f32 0.5, %v3927_v32  ;;  %v3936_v43 = vadd.f32 %v3041_v36, %v3887_v10  ;;  %v1268_v44 = vpop.f32.mrb[39].mxu1 }
 0x2de   : > { %v3314_v45 = vpop.eup %3313  ;;  %1316 = vst [vmem:[%s3894_s26 + $0x20] sm:$0xff] %v3930_v35  ;;  %v1364_v46 = vmul.f32 0.5, %v3930_v35  ;;  %v3942_v47 = vadd.f32 %v3887_v10, %v1268_v44  ;;  %v1474_v55 = vmul.f32 %v3312_v37, %v3181_v39  ;;  %v3195_v34 = vpop.permute.xlu0 %3194  ;;  %v3192_v37 = vunpack.i.h.bf16 %v3190_v18 }
 0x2df   : > { %v1473_v48 = vmul.f32 %v3314_v45, %v3177_v31  ;;  %v1388_v50 = vmul.f32 1.442695, %v1366_v41  ;;  %1319 = vst [vmem:[%s3894_s26 + $0x38] sm:$0xff] %v3936_v43  ;;  %v1367_v51 = vmul.f32 0.5, %v3936_v43  ;;  %1504 = vrot.lane.b32.xlu0 %v1472_v38, %s3533_s24  ;;  %v3316_v52 = vpop.eup %3315 }
 0x2e0   : > { %v1384_v53 = vmul.f32 1.442695, %v1364_v46  ;;  %1317 = vst [vmem:[%s3894_s26 + $0x28] sm:$0xff] %v3942_v47  ;;  %v1365_v54 = vmul.f32 0.5, %v3942_v47  ;;  %v1475_v59 = vmul.f32 %v3316_v52, %v3182_v49  ;;  %v3197_v52 = vunpack.i.h.bf16 %v3195_v34 }
 0x2e1   : > { %1506 = vrot.lane.b32.xlu1 %v1473_v48, %s3533_s24  ;;  %v1390_v56 = vmul.f32 1.442695, %v1367_v51 }
 0x2e2   : > { %3317 = vpow2.f32 %v1384_v53  ;;  %v1386_v57 = vmul.f32 1.442695, %v1365_v54  ;;  %v3044_v58 = vpop.f32.mrb[40].mxu1 }
 0x2e3   : > { %3319 = vpow2.f32 %v1388_v50  ;;  %v3953_v60 = vadd.f32 %v3044_v58, %v3887_v10  ;;  %v1281_v61 = vpop.f32.mrb[41].mxu1  ;;  %1508 = vrot.lane.b32.xlu0 %v1474_v55, %s3533_s24  ;;  %v3200_v50 = vpop.permute.xlu1 %3199 }
 0x2e4   : > { %3321 = vpow2.f32 %v1386_v57  ;;  %v3957_v62 = vadd.f32 %v3887_v10, %v1281_v61  ;;  %v3045_v63 = vpop.f32.mrb[42].mxu1  ;;  %v3201_v55 = vunpack.i.l.bf16 %v3200_v50  ;;  %v3205_v58 = vpop.permute.xlu0 %3204 }
 0x2e5   : > { %1322 = vst [vmem:[%s3894_s26 + $0x50] sm:$0xff] %v3953_v60  ;;  %v1370_v2 = vmul.f32 0.5, %v3953_v60  ;;  %v3963_v3 = vadd.f32 %v3045_v63, %v3887_v10  ;;  %v1284_v4 = vpop.f32.mrb[43].mxu1  ;;  %1510 = vrot.lane.b32.xlu1 %v1475_v59, %s3533_s24  ;;  %3323 = vpow2.f32 %v1390_v56  ;;  %v3202_v59 = vunpack.i.h.bf16 %v3200_v50 }
 0x2e6   : > { %1320 = vst [vmem:[%s3894_s26 + $0x40] sm:$0xff] %v3957_v62  ;;  %v1368_v5 = vmul.f32 0.5, %v3957_v62  ;;  %v3970_v40 = vadd.f32 %v3887_v10, %v1284_v4  ;;  %v3206_v4 = vunpack.i.l.bf16 %v3205_v58 }
 0x2e7   : > { %v1396_v6 = vmul.f32 1.442695, %v1370_v2  ;;  %1323 = vst [vmem:[%s3894_s26 + $0x58] sm:$0xff] %v3963_v3  ;;  %v1371_v7 = vmul.f32 0.5, %v3963_v3  ;;  %v3210_v0 = vpop.permute.xlu1 %3209 }
 0x2e8   : > { %v1392_v8 = vmul.f32 1.442695, %v1368_v5  ;;  %1321 = vst [vmem:[%s3894_s26 + $0x48] sm:$0xff] %v3970_v40  ;;  %v1369_v9 = vmul.f32 0.5, %v3970_v40 }
 0x2e9   : > { %v1398_v14 = vmul.f32 1.442695, %v1371_v7  ;;  %v3207_v7 = vunpack.i.h.bf16 %v3205_v58 }
 0x2ea   : > { %3325 = vpow2.f32 %v1392_v8  ;;  %v1394_v17 = vmul.f32 1.442695, %v1369_v9  ;;  %v3048_v20 = vpop.f32.mrb[44].mxu1  ;;  %v3211_v8 = vunpack.i.l.bf16 %v3210_v0 }
 0x2eb   : > { %3327 = vpow2.f32 %v1396_v6  ;;  %v3979_v23 = vadd.f32 %v3048_v20, %v3887_v10  ;;  %v1297_v24 = vpop.f32.mrb[45].mxu1 }
 0x2ec   : > { %v3318_v42 = vpop.eup %3317  ;;  %3329 = vpow2.f32 %v1394_v17  ;;  %v3982_v25 = vadd.f32 %v3887_v10, %v1297_v24  ;;  %v3049_v26 = vpop.f32.mrb[46].mxu1 }
 0x2ed   : > { %v3320_v1 = vpop.eup %3319  ;;  %v1476_v11 = vmul.f32 %v3318_v42, %v3186_v12  ;;  %1326 = vst [vmem:[%s3894_s26 + $0x70] sm:$0xff] %v3979_v23  ;;  %v1374_v27 = vmul.f32 0.5, %v3979_v23  ;;  %v3988_v28 = vadd.f32 %v3049_v26, %v3887_v10  ;;  %v1300_v29 = vpop.f32.mrb[47].mxu1  ;;  %3331 = vpow2.f32 %v1398_v14  ;;  %v3277_v12 = vld [vmem:[%s4294_s10] sm:$0xff]   ;;  %v3278_v14 = vld [vmem:[%s4294_s10 + $0x8] sm:$0xff]   ;;  %v3279_v26 = vld [vmem:[%s4294_s10 + $0x10] sm:$0xff]  }
 0x2ee   : > { %v3322_v30 = vpop.eup %3321  ;;  %1324 = vst [vmem:[%s3894_s26 + $0x60] sm:$0xff] %v3982_v25  ;;  %v1372_v31 = vmul.f32 0.5, %v3982_v25  ;;  %v3994_v33 = vadd.f32 %v3887_v10, %v1300_v29  ;;  %v1478_v46 = vmul.f32 %v3320_v1, %v3191_v15  ;;  %v3196_v10 = vunpack.i.l.bf16 %v3195_v34  ;;  %3082 = vmatprep.subr.bf16.mxu1 %v3277_v12  ;;  %v3281_v15 = vld [vmem:[%s4294_s10 + $0x20] sm:$0xff]  }
 0x2ef   : > { %v1477_v36 = vmul.f32 %v3322_v30, %v3187_v21  ;;  %v1404_v38 = vmul.f32 1.442695, %v1374_v27  ;;  %1327 = vst [vmem:[%s3894_s26 + $0x78] sm:$0xff] %v3988_v28  ;;  %v1375_v39 = vmul.f32 0.5, %v3988_v28  ;;  %1512 = vrot.lane.b32.xlu0 %v1476_v11, %s3533_s24  ;;  %v3324_v41 = vpop.eup %3323  ;;  %v3212_v21 = vunpack.i.h.bf16 %v3210_v0  ;;  %3083 = vmatpush3.bf16.msra.mxu1 %v3277_v12  ;;  %v3280_v11 = vld [vmem:[%s4294_s10 + $0x18] sm:$0xff]   ;;  %v3282_v27 = vld [vmem:[%s4294_s10 + $0x28] sm:$0xff]  }
 0x2f0   : > { %v1400_v44 = vmul.f32 1.442695, %v1372_v31  ;;  %1325 = vst [vmem:[%s3894_s26 + $0x68] sm:$0xff] %v3994_v33  ;;  %v1373_v45 = vmul.f32 0.5, %v3994_v33  ;;  %v1479_v51 = vmul.f32 %v3324_v41, %v3192_v37  ;;  %3084 = vmatprep.subr.bf16.mxu1 %v3278_v14  ;;  %v3299_v12 = vld [vmem:[%s4296_s12 + $0x44] ss:$8 sps:$4 sm:$0xff]  }
 0x2f1   : > { %3333 = vpow2.f32 %v1404_v38  ;;  %1514 = vrot.lane.b32.xlu1 %v1477_v36, %s3533_s24  ;;  %v1406_v48 = vmul.f32 1.442695, %v1375_v39 }
 0x2f2   : > { %3335 = vpow2.f32 %v1400_v44  ;;  %v1402_v49 = vmul.f32 1.442695, %v1373_v45 }
 0x2f3   : > { %1516 = vrot.lane.b32.xlu0 %v1478_v46, %s3533_s24  ;;  %3085 = vmatpush3.bf16.msra.mxu1 %v3278_v14  ;;  %v3297_v14 = vld [vmem:[%s4296_s12 + $0x40] ss:$8 sps:$4 sm:$0xff]  }
 0x2f4   : > { %v3326_v53 = vpop.eup %3325  ;;  %3337 = vpow2.f32 %v1402_v49  ;;  %3086 = vmatprep.subr.bf16.mxu1 %v3279_v26 }
 0x2f5   : > { %v3328_v54 = vpop.eup %3327  ;;  %v1480_v56 = vmul.f32 %v3326_v53, %v3196_v10  ;;  %1518 = vrot.lane.b32.xlu1 %v1479_v51, %s3533_s24  ;;  %3339 = vpow2.f32 %v1406_v48 }
 0x2f6   : > { %v3330_v57 = vpop.eup %3329  ;;  %v1482_v2 = vmul.f32 %v3328_v54, %v3201_v55 }
 0x2f7   : > { %v1481_v61 = vmul.f32 %v3330_v57, %v3197_v52  ;;  %1520 = vrot.lane.b32.xlu0 %v1480_v56, %s3533_s24  ;;  %v3332_v63 = vpop.eup %3331  ;;  %3087 = vmatpush3.bf16.msra.mxu1 %v3279_v26 }
 0x2f8   : > { %v1483_v6 = vmul.f32 %v3332_v63, %v3202_v59  ;;  %3088 = vmatprep.subr.bf16.mxu1 %v3280_v11 }
 0x2f9   : > { %1522 = vrot.lane.b32.xlu1 %v1481_v61, %s3533_s24 }
 0x2fb   : > { %v3334_v5 = vpop.eup %3333  ;;  %1524 = vrot.lane.b32.xlu0 %v1482_v2, %s3533_s24  ;;  %3089 = vmatpush3.bf16.msra.mxu1 %v3280_v11 }
 0x2fc   : > { %v3336_v9 = vpop.eup %3335  ;;  %v1486_v24 = vmul.f32 %v3334_v5, %v3211_v8  ;;  %3090 = vmatprep.subr.bf16.mxu1 %v3281_v15  ;;  %v3288_v5 = vld [vmem:[%s4296_s12 + $0x10] ss:$8 sps:$4 sm:$0xff]   ;;  %v3296_v8 = vld [vmem:[%s4296_s12 + $0x34] ss:$8 sps:$4 sm:$0xff]  }
 0x2fd   : > { %v1484_v17 = vmul.f32 %v3336_v9, %v3206_v4  ;;  %1526 = vrot.lane.b32.xlu1 %v1483_v6, %s3533_s24  ;;  %v3290_v4 = vld [vmem:[%s4296_s12 + $0x14] ss:$8 sps:$4 sm:$0xff]   ;;  %v3293_v6 = vld [vmem:[%s4296_s12 + $0x24] ss:$8 sps:$4 sm:$0xff]   ;;  %v3294_v9 = vld [vmem:[%s4296_s12 + $0x30] ss:$8 sps:$4 sm:$0xff]  }
 0x2fe   : > { %v3338_v18 = vpop.eup %3337 }
 0x2ff   : > { %v1485_v20 = vmul.f32 %v3338_v18, %v3207_v7  ;;  %1528 = vrot.lane.b32.xlu0 %v1484_v17, %s3533_s24  ;;  %v3340_v42 = vpop.eup %3339  ;;  %3091 = vmatpush3.bf16.msra.mxu1 %v3281_v15  ;;  %v3291_v7 = vld [vmem:[%s4296_s12 + $0x20] ss:$8 sps:$4 sm:$0xff]   ;;  %v3302_v17 = vld [vmem:[%s4296_s12 + $0x54] ss:$8 sps:$4 sm:$0xff]   ;;  %v3300_v18 = vld [vmem:[%s4296_s12 + $0x50] ss:$8 sps:$4 sm:$0xff]  }
 0x300   : > { %v1487_v1 = vmul.f32 %v3340_v42, %v3212_v21  ;;  %3092 = vmatprep.subr.bf16.mxu1 %v3282_v27 }
 0x301   : > { %1530 = vrot.lane.b32.xlu1 %v1485_v20, %s3533_s24  ;;  %v4113_v20 = vld [vmem:[%s4293_s9] ss:$0 sm:$0xff] }
 0x303   : > { %1532 = vrot.lane.b32.xlu0 %v1486_v24, %s3533_s24  ;;  %3093 = vmatpush3.bf16.msra.mxu1 %v3282_v27 }
 0x305   : > { %1534 = vrot.lane.b32.xlu1 %v1487_v1, %s3533_s24  ;;  %s4199_s24 = scalar_lea.vmem [#allocation2], %s2661_s25  ;;  %s3475_s25 = scalar_lea.vmem %s3474_s29, 4096 }
 0x306   : > { %s2554_s20 = sshll.u32 %s4199_s24, 4  ;;  %s4237_s20 = int_to_ptr.vmem [resolvable:$true] %s2554_s20 }
 0x307   : > { %s3469_s30 = scalar_lea.vmem %s4237_s20, 2048  ;;  %p3476_p0 = scmp.lt.s32.totalorder %s4237_s20, %s3474_s29 }
 0x308   : > { %p3470_p11 = scmp.ne.s32.totalorder %s4237_s20, %s3469_s30  ;;  %p3477_p1 = scmp.lt.s32.totalorder %s3475_s25, %s3469_s30 }
 0x30a   : > { %p3471_p12 = pnand %p3470_p11, %p3656_p5  ;;  %p3478_p2 = por %p3477_p1, %p3476_p0 }
 0x30c   : > { %p3472_p13 = pneg %p3471_p12 }
 0x30e   : > { %p3479_p3 = pnand %p3478_p2, %p3472_p13 }
 0x351   : > { %v1505_v29 = vpop.permute.xlu0 %1504 }
 0x352   : > { %v1552_v31 = vadd.f32 %v1505_v29, %v3900_v16 }
 0x353   : > { %v1507_v30 = vpop.permute.xlu1 %1506 }
 0x354   : > { %v1553_v34 = vadd.f32 %v1507_v30, %v3912_v22 }
 0x355   : > { %v1509_v36 = vpop.permute.xlu0 %1508 }
 0x356   : > { %v2730_v38 = vpack.c.bf16 %v1553_v34, %v1552_v31  ;;  %v1554_v41 = vadd.f32 %v1509_v36, %v3897_v13 }
 0x357   : > { %v1511_v39 = vpop.permute.xlu1 %1510 }
 0x358   : > { %v1555_v44 = vadd.f32 %v1511_v39, %v3906_v19  ;;  %3066 = vmatprep.mubr.msk.bf16.mxu0 %vm4034_vm1, %v2730_v38 }
 0x35a   : > { %v2733_v45 = vpack.c.bf16 %v1555_v44, %v1554_v41 }
 0x35c   : > { %3067 = vmatmul.mubr.msk.bf16.vlgmr.msra.gmra.mrb[16].mxu0 %vm4034_vm1, %v2733_v45 }
 0x361   : > { %v1513_v16 = vpop.permute.xlu0 %1512 }
 0x362   : > { %v1556_v46 = vadd.f32 %v1513_v16, %v3930_v35 }
 0x363   : > { %v1515_v22 = vpop.permute.xlu1 %1514 }
 0x364   : > { %v1557_v10 = vadd.f32 %v1515_v22, %v3942_v47 }
 0x365   : > { %v1517_v48 = vpop.permute.xlu0 %1516 }
 0x366   : > { %v2736_v49 = vpack.c.bf16 %v1557_v10, %v1556_v46  ;;  %v1558_v13 = vadd.f32 %v1517_v48, %v3927_v32 }
 0x367   : > { %v1519_v50 = vpop.permute.xlu1 %1518 }
 0x368   : > { %v1559_v19 = vadd.f32 %v1519_v50, %v3936_v43  ;;  %3070 = vmatprep.mubr.msk.bf16.mxu0 %vm4034_vm1, %v2736_v49 }
 0x369   : > { %v1521_v51 = vpop.permute.xlu0 %1520 }
 0x36a   : > { %v2739_v52 = vpack.c.bf16 %v1559_v19, %v1558_v13  ;;  %v1560_v54 = vadd.f32 %v1521_v51, %v3957_v62 }
 0x36b   : > { %v1523_v53 = vpop.permute.xlu1 %1522 }
 0x36c   : > { %v1561_v55 = vadd.f32 %v1523_v53, %v3970_v40  ;;  %3071 = vmatmul.mubr.msk.bf16.gmra.mrb[20].mxu0 %vm4034_vm1, %v2739_v52 }
 0x36d   : > { %v1525_v35 = vpop.permute.xlu0 %1524 }
 0x36e   : > { %v2742_v47 = vpack.c.bf16 %v1561_v55, %v1560_v54  ;;  %v1562_v32 = vadd.f32 %v1525_v35, %v3953_v60 }
 0x36f   : > { %v1527_v56 = vpop.permute.xlu1 %1526 }
 0x370   : > { %v1563_v43 = vadd.f32 %v1527_v56, %v3963_v3  ;;  %3074 = vmatprep.mubr.msk.bf16.mxu0 %vm4034_vm1, %v2742_v47 }
 0x371   : > { %v1529_v57 = vpop.permute.xlu0 %1528 }
 0x372   : > { %v2745_v58 = vpack.c.bf16 %v1563_v43, %v1562_v32  ;;  %v1564_v62 = vadd.f32 %v1529_v57, %v3982_v25  ;;  %v3283_v25 = vld [vmem:[%s4294_s10 + $0x30] sm:$0xff]  }
 0x373   : > { %v1531_v59 = vpop.permute.xlu1 %1530  ;;  %3094 = vmatprep.subr.bf16.mxu1 %v3283_v25 }
 0x374   : > { %v1565_v40 = vadd.f32 %v1531_v59, %v3994_v33  ;;  %3075 = vmatmul.mubr.msk.bf16.gmra.mrb[24].mxu0 %vm4034_vm1, %v2745_v58  ;;  %3095 = vmatpush3.bf16.msra.mxu1 %v3283_v25  ;;  %v3284_v33 = vld [vmem:[%s4294_s10 + $0x38] sm:$0xff]  }
 0x375   : > { %v1533_v61 = vpop.permute.xlu0 %1532  ;;  %3096 = vmatprep.subr.bf16.mxu1 %v3284_v33 }
 0x376   : > { %v2748_v63 = vpack.c.bf16 %v1565_v40, %v1564_v62  ;;  %v1566_v60 = vadd.f32 %v1533_v61, %v3979_v23  ;;  %v3285_v23 = vld [vmem:[%s4296_s12] ss:$8 sps:$4 sm:$0xff]  }
 0x377   : > { %v1535_v0 = vpop.permute.xlu1 %1534 }
 0x378   : > { %v1567_v3 = vadd.f32 %v1535_v0, %v3988_v28  ;;  %3078 = vmatprep.mubr.msk.bf16.mxu0 %vm4034_vm1, %v2748_v63  ;;  %3097 = vmatpush3.bf16.msra.mxu1 %v3284_v33  ;;  %v3287_v28 = vld [vmem:[%s4296_s12 + $0x4] ss:$8 sps:$4 sm:$0xff]  }
 0x379   : > { %2149 = vmatprep.subr.bf16.mxu0 %v3287_v28 }
 0x37a   : > { %v2751_v2 = vpack.c.bf16 %v1567_v3, %v1566_v60  ;;  %2150 = vmatpush1.bf16.msra.mxu0 %v3285_v23 }
 0x37b   : > { %2151 = vmatprep.subr.bf16.mxu0 %v3290_v4 }
 0x37c   : > { %3079 = vmatmul.mubr.msk.bf16.gmra.mrb[28].mxu0 %vm4034_vm1, %v2751_v2 }
 0x37e   : > { %2152 = vmatpush1.bf16.msra.mxu0 %v3288_v5 }
 0x37f   : > { %2153 = vmatprep.subr.bf16.mxu0 %v3293_v6 }
 0x382   : > { %2154 = vmatpush1.bf16.msra.mxu0 %v3291_v7 }
 0x383   : > { %2155 = vmatprep.subr.bf16.mxu0 %v3296_v8 }
 0x386   : > { %2156 = vmatpush1.bf16.msra.mxu0 %v3294_v9 }
 0x387   : > { %2157 = vmatprep.subr.bf16.mxu0 %v3299_v12 }
 0x38a   : > { %2158 = vmatpush1.bf16.msra.mxu0 %v3297_v14 }
 0x38b   : > { %2159 = vmatprep.subr.bf16.mxu0 %v3302_v17 }
 0x38e   : > { %2160 = vmatpush1.bf16.msra.mxu0 %v3300_v18 }
 0x42f   : > { %v3068_v21 = vpop.f32.mrb[16].mxu0 }
 0x430   : > { %v1707_v24 = vadd.f32 %v3068_v21, %v4113_v20  ;;  %v1698_v42 = vpop.f32.mrb[17].mxu0 }
 0x431   : > { %v1699_v26 = vadd.f32 %v4113_v20, %v1698_v42  ;;  %v3069_v1 = vpop.f32.mrb[18].mxu0 }
 0x432   : > { %v1779_v11 = vmul.f32 0.2, %v1707_v24  ;;  %v1710_v15 = vadd.f32 %v3069_v1, %v4113_v20  ;;  %v1701_v27 = vpop.f32.mrb[19].mxu0  ;;  %vm1763_vm2 = vcmp.gt.f32.partialorder %v1707_v24, 0.0 }
 0x433   : > { %v1777_v29 = vmul.f32 0.2, %v1699_v26  ;;  %v1702_v30 = vadd.f32 %v4113_v20, %v1701_v27  ;;  %vm1761_vm3 = vcmp.gt.f32.partialorder %v1699_v26, 0.0 }
 0x434   : > { %vm1764_vm4 = vcmp.gt.f32.partialorder %v1710_v15, 0.0  ;;  %v1780_v31 = vmul.f32 0.2, %v1710_v15  ;;  %v1795_v36 = vsel %vm1763_vm2, %v1707_v24, %v1779_v11 }
 0x435   : > { %vm1762_vm5 = vcmp.gt.f32.partialorder %v1702_v30, 0.0  ;;  %v1778_v34 = vmul.f32 0.2, %v1702_v30  ;;  %v1793_v39 = vsel %vm1761_vm3, %v1699_v26, %v1777_v29 }
 0x436   : > { %v1796_v37 = vsel %vm1764_vm4, %v1710_v15, %v1780_v31  ;;  %v3308_v31 = vld [vmem:[%s4296_s12 + $0x74] ss:$8 sps:$4 sm:$0xff]  }
 0x437   : > { %v1826_v38 = vpack.c.bf16 %v1796_v37, %v1795_v36  ;;  %v1794_v41 = vsel %vm1762_vm5, %v1702_v30, %v1778_v34  ;;  %v3305_v30 = vld [vmem:[%s4296_s12 + $0x64] ss:$8 sps:$4 sm:$0xff]   ;;  %v3306_v34 = vld [vmem:[%s4296_s12 + $0x70] ss:$8 sps:$4 sm:$0xff]   ;;  %v3534_v36 = vmov 0  }
 0x438   : > { %v1825_v44 = vpack.c.bf16 %v1794_v41, %v1793_v39  ;;  %2161 = vmatprep.subr.bf16.mxu0 %v3305_v30  ;;  %2181 = vmatprep.mubr.bf16.mxu0 %v3534_v36  ;;  %v4147_v37 = vld [vmem:[%s4295_s11] ss:$0 sm:$0xff] }
 0x43a   : > { %3098 = vmatprep.mubr.bf16.mxu1 %v1825_v44 }
 0x43b   : > { %3099 = vmatmul.mubr.bf16.vlgmr.msra.gmra.mrb[48].mxu1 %v1826_v38 }
 0x43f   : > { %v3072_v45 = vpop.f32.mrb[20].mxu0 }
 0x440   : > { %v1723_v16 = vadd.f32 %v3072_v45, %v4113_v20  ;;  %v1714_v22 = vpop.f32.mrb[21].mxu0 }
 0x441   : > { %v1715_v46 = vadd.f32 %v4113_v20, %v1714_v22  ;;  %v3073_v10 = vpop.f32.mrb[22].mxu0 }
 0x442   : > { %v1783_v48 = vmul.f32 0.2, %v1723_v16  ;;  %v1726_v49 = vadd.f32 %v3073_v10, %v4113_v20  ;;  %v1717_v50 = vpop.f32.mrb[23].mxu0  ;;  %vm1767_vm6 = vcmp.gt.f32.partialorder %v1723_v16, 0.0 }
 0x443   : > { %v1781_v13 = vmul.f32 0.2, %v1715_v46  ;;  %v1718_v19 = vadd.f32 %v4113_v20, %v1717_v50  ;;  %vm1765_vm7 = vcmp.gt.f32.partialorder %v1715_v46, 0.0 }
 0x444   : > { %vm1768_vm8 = vcmp.gt.f32.partialorder %v1726_v49, 0.0  ;;  %v1784_v51 = vmul.f32 0.2, %v1726_v49  ;;  %v1799_v53 = vsel %vm1767_vm6, %v1723_v16, %v1783_v48 }
 0x445   : > { %vm1766_vm9 = vcmp.gt.f32.partialorder %v1718_v19, 0.0  ;;  %v1782_v52 = vmul.f32 0.2, %v1718_v19  ;;  %v1797_v35 = vsel %vm1765_vm7, %v1715_v46, %v1781_v13 }
 0x446   : > { %v1800_v54 = vsel %vm1768_vm8, %v1726_v49, %v1784_v51 }
 0x447   : > { %v3076_v55 = vpop.f32.mrb[24].mxu0  ;;  %v1798_v47 = vsel %vm1766_vm9, %v1718_v19, %v1782_v52  ;;  %v1828_v56 = vpack.c.bf16 %v1800_v54, %v1799_v53 }
 0x448   : > { %v1739_v32 = vadd.f32 %v3076_v55, %v4113_v20  ;;  %v1730_v43 = vpop.f32.mrb[25].mxu0  ;;  %v1827_v57 = vpack.c.bf16 %v1798_v47, %v1797_v35 }
 0x449   : > { %v1731_v58 = vadd.f32 %v4113_v20, %v1730_v43  ;;  %v3077_v59 = vpop.f32.mrb[26].mxu0 }
 0x44a   : > { %v1787_v62 = vmul.f32 0.2, %v1739_v32  ;;  %v1742_v40 = vadd.f32 %v3077_v59, %v4113_v20  ;;  %v1733_v61 = vpop.f32.mrb[27].mxu0  ;;  %3102 = vmatprep.mubr.bf16.mxu1 %v1827_v57  ;;  %vm1771_vm10 = vcmp.gt.f32.partialorder %v1739_v32, 0.0 }
 0x44b   : > { %v1785_v63 = vmul.f32 0.2, %v1731_v58  ;;  %v1734_v0 = vadd.f32 %v4113_v20, %v1733_v61  ;;  %3103 = vmatmul.mubr.bf16.gmra.mrb[52].mxu1 %v1828_v56  ;;  %vm1769_vm11 = vcmp.gt.f32.partialorder %v1731_v58, 0.0 }
 0x44c   : > { %vm1772_vm12 = vcmp.gt.f32.partialorder %v1742_v40, 0.0  ;;  %v1788_v60 = vmul.f32 0.2, %v1742_v40  ;;  %v1803_v2 = vsel %vm1771_vm10, %v1739_v32, %v1787_v62 }
 0x44d   : > { %vm1770_vm13 = vcmp.gt.f32.partialorder %v1734_v0, 0.0  ;;  %v1786_v3 = vmul.f32 0.2, %v1734_v0  ;;  %v1801_v23 = vsel %vm1769_vm11, %v1731_v58, %v1785_v63 }
 0x44e   : > { %v1804_v25 = vsel %vm1772_vm12, %v1742_v40, %v1788_v60 }
 0x44f   : > { %v3080_v33 = vpop.f32.mrb[28].mxu0  ;;  %v1802_v28 = vsel %vm1770_vm13, %v1734_v0, %v1786_v3  ;;  %v1830_v4 = vpack.c.bf16 %v1804_v25, %v1803_v2 }
 0x450   : > { %v1755_v5 = vadd.f32 %v3080_v33, %v4113_v20  ;;  %v1746_v6 = vpop.f32.mrb[29].mxu0  ;;  %v1829_v7 = vpack.c.bf16 %v1802_v28, %v1801_v23 }
 0x451   : > { %v1747_v8 = vadd.f32 %v4113_v20, %v1746_v6  ;;  %v3081_v9 = vpop.f32.mrb[30].mxu0 }
 0x452   : > { %v1791_v12 = vmul.f32 0.2, %v1755_v5  ;;  %v1758_v14 = vadd.f32 %v3081_v9, %v4113_v20  ;;  %v1749_v17 = vpop.f32.mrb[31].mxu0  ;;  %3106 = vmatprep.mubr.bf16.mxu1 %v1829_v7  ;;  %vm1775_vm14 = vcmp.gt.f32.partialorder %v1755_v5, 0.0 }
 0x453   : > { %v1789_v18 = vmul.f32 0.2, %v1747_v8  ;;  %v1750_v21 = vadd.f32 %v4113_v20, %v1749_v17  ;;  %3107 = vmatmul.mubr.bf16.gmra.mrb[56].mxu1 %v1830_v4  ;;  %vm1773_vm15 = vcmp.gt.f32.partialorder %v1747_v8, 0.0  ;;  %v3303_v20 = vld [vmem:[%s4296_s12 + $0x60] ss:$8 sps:$4 sm:$0xff]  }
 0x454   : > { %vm1776_vm0 = vcmp.gt.f32.partialorder %v1758_v14, 0.0  ;;  %v1792_v24 = vmul.f32 0.2, %v1758_v14  ;;  %v1807_v26 = vsel %vm1775_vm14, %v1755_v5, %v1791_v12  ;;  %2162 = vmatpush1.bf16.msra.mxu0 %v3303_v20 }
 0x455   : > { %vm1774_vm1 = vcmp.gt.f32.partialorder %v1750_v21, 0.0  ;;  %v1790_v42 = vmul.f32 0.2, %v1750_v21  ;;  %v1805_v11 = vsel %vm1773_vm15, %v1747_v8, %v1789_v18  ;;  %2163 = vmatprep.subr.bf16.mxu0 %v3308_v31 }
 0x456   : > { %v1808_v1 = vsel %vm1776_vm0, %v1758_v14, %v1792_v24 }
 0x457   : > { %v1806_v15 = vsel %vm1774_vm1, %v1750_v21, %v1790_v42  ;;  %v1832_v27 = vpack.c.bf16 %v1808_v1, %v1807_v26 }
 0x458   : > { %v1831_v29 = vpack.c.bf16 %v1806_v15, %v1805_v11  ;;  %2164 = vmatpush1.bf16.msra.mxu0 %v3306_v34 }
 0x45a   : > { %3110 = vmatprep.mubr.bf16.mxu1 %v1831_v29 }
 0x45b   : > { %3111 = vmatmul.mubr.bf16.gmra.mrb[60].mxu1 %v1832_v27 }
 0x50e   : > { %v3100_v38 = vpop.f32.mrb[48].mxu1 }
 0x50f   : > { %v1931_v39 = vadd.f32 %v3100_v38, %v4147_v37  ;;  %v1922_v41 = vpop.f32.mrb[49].mxu1 }
 0x510   : > { %v1923_v44 = vadd.f32 %v4147_v37, %v1922_v41  ;;  %v3101_v45 = vpop.f32.mrb[50].mxu1 }
 0x511   : > { %v2003_v16 = vmul.f32 0.2, %v1931_v39  ;;  %v1934_v22 = vadd.f32 %v3101_v45, %v4147_v37  ;;  %v1925_v46 = vpop.f32.mrb[51].mxu1  ;;  %vm1987_vm2 = vcmp.gt.f32.partialorder %v1931_v39, 0.0 }
 0x512   : > { %v2001_v10 = vmul.f32 0.2, %v1923_v44  ;;  %v1926_v48 = vadd.f32 %v4147_v37, %v1925_v46  ;;  %vm1985_vm3 = vcmp.gt.f32.partialorder %v1923_v44, 0.0 }
 0x513   : > { %vm1988_vm4 = vcmp.gt.f32.partialorder %v1934_v22, 0.0  ;;  %v2004_v49 = vmul.f32 0.2, %v1934_v22  ;;  %v2019_v13 = vsel %vm1987_vm2, %v1931_v39, %v2003_v16 }
 0x514   : > { %vm1986_vm5 = vcmp.gt.f32.partialorder %v1926_v48, 0.0  ;;  %v2002_v50 = vmul.f32 0.2, %v1926_v48  ;;  %v2017_v51 = vsel %vm1985_vm3, %v1923_v44, %v2001_v10 }
 0x515   : > { %v2020_v19 = vsel %vm1988_vm4, %v1934_v22, %v2004_v49 }
 0x516   : > { %v2018_v52 = vsel %vm1986_vm5, %v1926_v48, %v2002_v50  ;;  %v2050_v53 = vpack.c.bf16 %v2020_v19, %v2019_v13  ;;  %v2057_v13 = vld [vmem:[%s4297_s13] sm:$0x3] }
 0x517   : > { %v2049_v54 = vpack.c.bf16 %v2018_v52, %v2017_v51 }
 0x519   : > { %2182 = vmatmul.mubr.bf16.vlgmr.msra.gmra.mrb[32].mxu0 %v2049_v54 }
 0x51a   : > { %2191 = vmatprep.mubr.bf16.mxu0 %v3534_v36 }
 0x51e   : > { %v3104_v55 = vpop.f32.mrb[52].mxu1 }
 0x51f   : > { %v1947_v35 = vadd.f32 %v3104_v55, %v4147_v37  ;;  %v1938_v47 = vpop.f32.mrb[53].mxu1 }
 0x520   : > { %v1939_v56 = vadd.f32 %v4147_v37, %v1938_v47  ;;  %v3105_v32 = vpop.f32.mrb[54].mxu1 }
 0x521   : > { %v2007_v43 = vmul.f32 0.2, %v1947_v35  ;;  %v1950_v57 = vadd.f32 %v3105_v32, %v4147_v37  ;;  %v1941_v58 = vpop.f32.mrb[55].mxu1  ;;  %2192 = vmatmul.mubr.bf16.gmra.mrb[36].mxu0 %v2050_v53  ;;  %vm1991_vm6 = vcmp.gt.f32.partialorder %v1947_v35, 0.0 }
 0x522   : > { %v2005_v59 = vmul.f32 0.2, %v1939_v56  ;;  %v1942_v62 = vadd.f32 %v4147_v37, %v1941_v58  ;;  %2201 = vmatprep.mubr.bf16.mxu0 %v3534_v36  ;;  %vm1989_vm7 = vcmp.gt.f32.partialorder %v1939_v56, 0.0 }
 0x523   : > { %vm1992_vm8 = vcmp.gt.f32.partialorder %v1950_v57, 0.0  ;;  %v2008_v40 = vmul.f32 0.2, %v1950_v57  ;;  %v2023_v63 = vsel %vm1991_vm6, %v1947_v35, %v2007_v43 }
 0x524   : > { %vm1990_vm9 = vcmp.gt.f32.partialorder %v1942_v62, 0.0  ;;  %v2006_v61 = vmul.f32 0.2, %v1942_v62  ;;  %v2021_v3 = vsel %vm1989_vm7, %v1939_v56, %v2005_v59 }
 0x525   : > { %v2024_v0 = vsel %vm1992_vm8, %v1950_v57, %v2008_v40 }
 0x526   : > { %v3108_v60 = vpop.f32.mrb[56].mxu1  ;;  %v2022_v2 = vsel %vm1990_vm9, %v1942_v62, %v2006_v61  ;;  %v2052_v25 = vpack.c.bf16 %v2024_v0, %v2023_v63 }
 0x527   : > { %v1963_v33 = vadd.f32 %v3108_v60, %v4147_v37  ;;  %v1954_v23 = vpop.f32.mrb[57].mxu1  ;;  %v2051_v28 = vpack.c.bf16 %v2022_v2, %v2021_v3 }
 0x528   : > { %v1955_v4 = vadd.f32 %v4147_v37, %v1954_v23  ;;  %v3109_v5 = vpop.f32.mrb[58].mxu1 }
 0x529   : > { %v2011_v6 = vmul.f32 0.2, %v1963_v33  ;;  %v1966_v7 = vadd.f32 %v3109_v5, %v4147_v37  ;;  %v1957_v8 = vpop.f32.mrb[59].mxu1  ;;  %2202 = vmatmul.mubr.bf16.gmra.mrb[40].mxu0 %v2051_v28  ;;  %vm1995_vm10 = vcmp.gt.f32.partialorder %v1963_v33, 0.0 }
 0x52a   : > { %v2009_v9 = vmul.f32 0.2, %v1955_v4  ;;  %v1958_v12 = vadd.f32 %v4147_v37, %v1957_v8  ;;  %2211 = vmatprep.mubr.bf16.mxu0 %v3534_v36  ;;  %vm1993_vm11 = vcmp.gt.f32.partialorder %v1955_v4, 0.0 }
 0x52b   : > { %vm1996_vm12 = vcmp.gt.f32.partialorder %v1966_v7, 0.0  ;;  %v2012_v14 = vmul.f32 0.2, %v1966_v7  ;;  %v2027_v18 = vsel %vm1995_vm10, %v1963_v33, %v2011_v6 }
 0x52c   : > { %vm1994_vm13 = vcmp.gt.f32.partialorder %v1958_v12, 0.0  ;;  %v2010_v17 = vmul.f32 0.2, %v1958_v12  ;;  %v2025_v42 = vsel %vm1993_vm11, %v1955_v4, %v2009_v9 }
 0x52d   : > { %v2028_v21 = vsel %vm1996_vm12, %v1966_v7, %v2012_v14 }
 0x52e   : > { %v3112_v24 = vpop.f32.mrb[60].mxu1  ;;  %v2026_v26 = vsel %vm1994_vm13, %v1958_v12, %v2010_v17  ;;  %v2054_v1 = vpack.c.bf16 %v2028_v21, %v2027_v18 }
 0x52f   : > { %v1979_v11 = vadd.f32 %v3112_v24, %v4147_v37  ;;  %v1970_v15 = vpop.f32.mrb[61].mxu1  ;;  %v2053_v27 = vpack.c.bf16 %v2026_v26, %v2025_v42 }
 0x530   : > { %v1971_v29 = vadd.f32 %v4147_v37, %v1970_v15  ;;  %v3113_v30 = vpop.f32.mrb[62].mxu1 }
 0x531   : > { %v2015_v20 = vmul.f32 0.2, %v1979_v11  ;;  %v1982_v31 = vadd.f32 %v3113_v30, %v4147_v37  ;;  %v1973_v34 = vpop.f32.mrb[63].mxu1  ;;  %2212 = vmatmul.mubr.bf16.gmra.mrb[44].mxu0 %v2052_v25  ;;  %vm1999_vm14 = vcmp.gt.f32.partialorder %v1979_v11, 0.0 }
 0x532   : > { %v2013_v38 = vmul.f32 0.2, %v1971_v29  ;;  %v1974_v39 = vadd.f32 %v4147_v37, %v1973_v34  ;;  %2221 = vmatprep.mubr.bf16.mxu0 %v3534_v36  ;;  %vm1997_vm15 = vcmp.gt.f32.partialorder %v1971_v29, 0.0  ;;  %v2059_v37 = vlaneseq }
 0x533   : > { %vm2000_vm0 = vcmp.gt.f32.partialorder %v1982_v31, 0.0  ;;  %v2016_v41 = vmul.f32 0.2, %v1982_v31  ;;  %v2031_v45 = vsel %vm1999_vm14, %v1979_v11, %v2015_v20 }
 0x534   : > { %vm1998_vm1 = vcmp.gt.f32.partialorder %v1974_v39, 0.0  ;;  %v2014_v44 = vmul.f32 0.2, %v1974_v39  ;;  %v2029_v22 = vsel %vm1997_vm15, %v1971_v29, %v2013_v38  ;;  %v2060_v49 = vshrl.u32 %v2059_v37, 7 }
 0x535   : > { %v2032_v16 = vsel %vm2000_vm0, %v1982_v31, %v2016_v41 }
 0x536   : > { %v2030_v46 = vsel %vm1998_vm1, %v1974_v39, %v2014_v44  ;;  %v2056_v10 = vpack.c.bf16 %v2032_v16, %v2031_v45  ;;  %v2061_v50 = vsub.s32 0, %v2060_v49  ;;  %v2065_v19 = vsub.s32 1, %v2060_v49 }
 0x537   : > { %v2055_v48 = vpack.c.bf16 %v2030_v46, %v2029_v22 }
 0x538   : > { %v4175_v51 = vrot.slane %v2057_v13, %v2061_v50  ;;  %v4177_v52 = vrot.slane %v2057_v13, %v2065_v19 }
 0x539   : > { %2222 = vmatmul.mubr.bf16.gmra.mrb[48].mxu0 %v2053_v27 }
 0x53a   : > { %2231 = vmatprep.mubr.bf16.mxu0 %v3534_v36 }
 0x541   : > { %2232 = vmatmul.mubr.bf16.gmra.mrb[52].mxu0 %v2054_v1 }
 0x542   : > { %2241 = vmatprep.mubr.bf16.mxu0 %v3534_v36 }
 0x549   : > { %2242 = vmatmul.mubr.bf16.gmra.mrb[56].mxu0 %v2055_v48 }
 0x54a   : > { %2251 = vmatprep.mubr.bf16.mxu0 %v3534_v36 }
 0x551   : > { %2252 = vmatmul.mubr.bf16.gmra.mrb[60].mxu0 %v2056_v10 }
 0x5ec   : > { %v2183_v53 = vpop.f32.mrb[32].mxu0 }
 0x5ed   : > { %v2184_v54 = vadd.f32 %v2183_v53, %v4175_v51  ;;  %v2185_v55 = vpop.f32.mrb[33].mxu0 }
 0x5ee   : > { %v2186_v35 = vadd.f32 %v2185_v55, %v4177_v52  ;;  %v2187_v36 = vpop.f32.mrb[34].mxu0 }
 0x5ef   : > { %v2262_v47 = vsub.f32 0.0, %v2184_v54  ;;  %v2188_v56 = vadd.f32 %v2187_v36, %v4175_v51  ;;  %v2189_v32 = vpop.f32.mrb[35].mxu0 }
 0x5f0   : > { %v2263_v43 = vsub.f32 0.0, %v2186_v35  ;;  %v2190_v57 = vadd.f32 %v2189_v32, %v4177_v52 }
 0x5f1   : > { %v2294_v58 = vmul.f32 1.442695, %v2262_v47  ;;  %v2264_v59 = vsub.f32 0.0, %v2188_v56 }
 0x5f2   : > { %v2296_v62 = vmul.f32 1.442695, %v2263_v43  ;;  %v2265_v40 = vsub.f32 0.0, %v2190_v57 }
 0x5f3   : > { %3341 = vpow2.f32 %v2294_v58  ;;  %v2298_v61 = vmul.f32 1.442695, %v2264_v59 }
 0x5f4   : > { %3343 = vpow2.f32 %v2296_v62  ;;  %v2300_v63 = vmul.f32 1.442695, %v2265_v40  ;;  %v2193_v0 = vpop.f32.mrb[36].mxu0 }
 0x5f5   : > { %3345 = vpow2.f32 %v2298_v61  ;;  %v2194_v60 = vadd.f32 %v2193_v0, %v4175_v51  ;;  %v2195_v3 = vpop.f32.mrb[37].mxu0 }
 0x5f6   : > { %3347 = vpow2.f32 %v2300_v63  ;;  %v2196_v2 = vadd.f32 %v2195_v3, %v4177_v52  ;;  %v2197_v25 = vpop.f32.mrb[38].mxu0 }
 0x5f7   : > { %v2266_v33 = vsub.f32 0.0, %v2194_v60  ;;  %v2198_v23 = vadd.f32 %v2197_v25, %v4175_v51  ;;  %v2199_v28 = vpop.f32.mrb[39].mxu0 }
 0x5f8   : > { %v2267_v4 = vsub.f32 0.0, %v2196_v2  ;;  %v2200_v5 = vadd.f32 %v2199_v28, %v4177_v52 }
 0x5f9   : > { %v2302_v6 = vmul.f32 1.442695, %v2266_v33  ;;  %v2268_v7 = vsub.f32 0.0, %v2198_v23 }
 0x5fa   : > { %v2304_v8 = vmul.f32 1.442695, %v2267_v4  ;;  %v2269_v9 = vsub.f32 0.0, %v2200_v5 }
 0x5fb   : > { %3349 = vpow2.f32 %v2302_v6  ;;  %v2306_v12 = vmul.f32 1.442695, %v2268_v7 }
 0x5fc   : > { %3351 = vpow2.f32 %v2304_v8  ;;  %v2308_v14 = vmul.f32 1.442695, %v2269_v9  ;;  %v2203_v17 = vpop.f32.mrb[40].mxu0 }
 0x5fd   : > { %v3342_v18 = vpop.eup %3341  ;;  %3353 = vpow2.f32 %v2306_v12  ;;  %v2204_v21 = vadd.f32 %v2203_v17, %v4175_v51  ;;  %v2205_v24 = vpop.f32.mrb[41].mxu0 }
 0x5fe   : > { %v3344_v42 = vpop.eup %3343  ;;  %v2358_v26 = vadd.f32 1.0, %v3342_v18  ;;  %3355 = vpow2.f32 %v2308_v14  ;;  %v2206_v1 = vadd.f32 %v2205_v24, %v4177_v52  ;;  %v2207_v11 = vpop.f32.mrb[42].mxu0 }
 0x5ff   : > { %v3346_v15 = vpop.eup %3345  ;;  %v2359_v27 = vadd.f32 1.0, %v3344_v42  ;;  %v2270_v29 = vsub.f32 0.0, %v2204_v21  ;;  %v2208_v30 = vadd.f32 %v2207_v11, %v4175_v51  ;;  %v2209_v20 = vpop.f32.mrb[43].mxu0 }
 0x600   : > { %v3348_v31 = vpop.eup %3347  ;;  %3357 = vrcp.f32 %v2358_v26  ;;  %v2360_v34 = vadd.f32 1.0, %v3346_v15  ;;  %v2271_v38 = vsub.f32 0.0, %v2206_v1  ;;  %v2210_v39 = vadd.f32 %v2209_v20, %v4177_v52 }
 0x601   : > { %3359 = vrcp.f32 %v2359_v27  ;;  %v2361_v41 = vadd.f32 1.0, %v3348_v31  ;;  %v2310_v44 = vmul.f32 1.442695, %v2270_v29  ;;  %v2272_v45 = vsub.f32 0.0, %v2208_v30 }
 0x602   : > { %3361 = vrcp.f32 %v2360_v34  ;;  %v2312_v16 = vmul.f32 1.442695, %v2271_v38  ;;  %v2273_v22 = vsub.f32 0.0, %v2210_v39 }
 0x603   : > { %3363 = vrcp.f32 %v2361_v41  ;;  %v2314_v46 = vmul.f32 1.442695, %v2272_v45 }
 0x604   : > { %3365 = vpow2.f32 %v2310_v44  ;;  %v2316_v10 = vmul.f32 1.442695, %v2273_v22  ;;  %v2213_v48 = vpop.f32.mrb[44].mxu0 }
 0x605   : > { %v3350_v37 = vpop.eup %3349  ;;  %3367 = vpow2.f32 %v2312_v16  ;;  %v2214_v49 = vadd.f32 %v2213_v48, %v4175_v51  ;;  %v2215_v50 = vpop.f32.mrb[45].mxu0 }
 0x606   : > { %v3352_v13 = vpop.eup %3351  ;;  %v2362_v19 = vadd.f32 1.0, %v3350_v37  ;;  %3369 = vpow2.f32 %v2314_v46  ;;  %v2216_v53 = vadd.f32 %v2215_v50, %v4177_v52  ;;  %v2217_v54 = vpop.f32.mrb[46].mxu0 }
 0x607   : > { %v3354_v55 = vpop.eup %3353  ;;  %v2363_v35 = vadd.f32 1.0, %v3352_v13  ;;  %3371 = vpow2.f32 %v2316_v10  ;;  %v2274_v36 = vsub.f32 0.0, %v2214_v49  ;;  %v2218_v47 = vadd.f32 %v2217_v54, %v4175_v51  ;;  %v2219_v56 = vpop.f32.mrb[47].mxu0 }
 0x608   : > { %v3356_v32 = vpop.eup %3355  ;;  %3373 = vrcp.f32 %v2362_v19  ;;  %v2364_v43 = vadd.f32 1.0, %v3354_v55  ;;  %v2275_v57 = vsub.f32 0.0, %v2216_v53  ;;  %v2220_v58 = vadd.f32 %v2219_v56, %v4177_v52 }
 0x609   : > { %3375 = vrcp.f32 %v2363_v35  ;;  %v2365_v59 = vadd.f32 1.0, %v3356_v32  ;;  %v2318_v62 = vmul.f32 1.442695, %v2274_v36  ;;  %v2276_v40 = vsub.f32 0.0, %v2218_v47 }
 0x60a   : > { %v3358_v61 = vpop.eup %3357  ;;  %3377 = vrcp.f32 %v2364_v43  ;;  %v2320_v63 = vmul.f32 1.442695, %v2275_v57  ;;  %v2277_v0 = vsub.f32 0.0, %v2220_v58 }
 0x60b   : > { %v3360_v60 = vpop.eup %3359  ;;  %3379 = vrcp.f32 %v2365_v59  ;;  %v2322_v3 = vmul.f32 1.442695, %v2276_v40 }
 0x60c   : > { %v3362_v2 = vpop.eup %3361  ;;  %v2801_v25 = vpack.c.bf16 %v3360_v60, %v3358_v61  ;;  %3381 = vpow2.f32 %v2318_v62  ;;  %v2324_v33 = vmul.f32 1.442695, %v2277_v0  ;;  %v2223_v23 = vpop.f32.mrb[48].mxu0 }
 0x60d   : > { %v3364_v28 = vpop.eup %3363  ;;  %3383 = vpow2.f32 %v2320_v63  ;;  %v2224_v4 = vadd.f32 %v2223_v23, %v4175_v51  ;;  %v2225_v5 = vpop.f32.mrb[49].mxu0 }
 0x60e   : > { %v3366_v6 = vpop.eup %3365  ;;  %2518 = vst [vmem:[%s4199_s24] sm:$0xff] %v2801_v25  ;;  %v2802_v7 = vpack.c.bf16 %v3364_v28, %v3362_v2  ;;  %3385 = vpow2.f32 %v2322_v3  ;;  %v2226_v8 = vadd.f32 %v2225_v5, %v4177_v52  ;;  %v2227_v9 = vpop.f32.mrb[50].mxu0 }
 0x60f   : > { %v3368_v12 = vpop.eup %3367  ;;  %v2366_v14 = vadd.f32 1.0, %v3366_v6  ;;  %3387 = vpow2.f32 %v2324_v33  ;;  %v2278_v17 = vsub.f32 0.0, %v2224_v4  ;;  %v2228_v18 = vadd.f32 %v2227_v9, %v4175_v51  ;;  %v2229_v21 = vpop.f32.mrb[51].mxu0 }
 0x610   : > { %v3370_v24 = vpop.eup %3369  ;;  %2519 = vst [vmem:[%s4199_s24 + $0x8] sm:$0xff] %v2802_v7  ;;  %v2367_v42 = vadd.f32 1.0, %v3368_v12  ;;  %v2279_v26 = vsub.f32 0.0, %v2226_v8  ;;  %v2230_v1 = vadd.f32 %v2229_v21, %v4177_v52 }
 0x611   : > { %v3372_v11 = vpop.eup %3371  ;;  %3389 = vrcp.f32 %v2366_v14  ;;  %v2368_v15 = vadd.f32 1.0, %v3370_v24  ;;  %v2326_v27 = vmul.f32 1.442695, %v2278_v17  ;;  %v2280_v29 = vsub.f32 0.0, %v2228_v18 }
 0x612   : > { %v3374_v30 = vpop.eup %3373  ;;  %3391 = vrcp.f32 %v2367_v42  ;;  %v2369_v20 = vadd.f32 1.0, %v3372_v11  ;;  %v2328_v31 = vmul.f32 1.442695, %v2279_v26  ;;  %v2281_v34 = vsub.f32 0.0, %v2230_v1 }
 0x613   : > { %v3376_v38 = vpop.eup %3375  ;;  %3393 = vrcp.f32 %v2368_v15  ;;  %v2330_v39 = vmul.f32 1.442695, %v2280_v29 }
 0x614   : > { %v3378_v41 = vpop.eup %3377  ;;  %v2803_v44 = vpack.c.bf16 %v3376_v38, %v3374_v30  ;;  %3395 = vrcp.f32 %v2369_v20  ;;  %v2332_v45 = vmul.f32 1.442695, %v2281_v34  ;;  %v2233_v16 = vpop.f32.mrb[52].mxu0 }
 0x615   : > { %v3380_v22 = vpop.eup %3379  ;;  %3397 = vpow2.f32 %v2326_v27  ;;  %v2234_v46 = vadd.f32 %v2233_v16, %v4175_v51  ;;  %v2235_v10 = vpop.f32.mrb[53].mxu0 }
 0x616   : > { %v3382_v48 = vpop.eup %3381  ;;  %2520 = vst [vmem:[%s4199_s24 + $0x10] sm:$0xff] %v2803_v44  ;;  %v2804_v37 = vpack.c.bf16 %v3380_v22, %v3378_v41  ;;  %3399 = vpow2.f32 %v2328_v31  ;;  %v2236_v49 = vadd.f32 %v2235_v10, %v4177_v52  ;;  %v2237_v50 = vpop.f32.mrb[54].mxu0 }
 0x617   : > { %v3384_v13 = vpop.eup %3383  ;;  %v2370_v19 = vadd.f32 1.0, %v3382_v48  ;;  %3401 = vpow2.f32 %v2330_v39  ;;  %v2282_v53 = vsub.f32 0.0, %v2234_v46  ;;  %v2238_v54 = vadd.f32 %v2237_v50, %v4175_v51  ;;  %v2239_v55 = vpop.f32.mrb[55].mxu0 }
 0x618   : > { %v3386_v35 = vpop.eup %3385  ;;  %2521 = vst [vmem:[%s4199_s24 + $0x18] sm:$0xff] %v2804_v37  ;;  %v2371_v36 = vadd.f32 1.0, %v3384_v13  ;;  %3403 = vpow2.f32 %v2332_v45  ;;  %v2283_v47 = vsub.f32 0.0, %v2236_v49  ;;  %v2240_v56 = vadd.f32 %v2239_v55, %v4177_v52 }
 0x619   : > { %v3388_v32 = vpop.eup %3387  ;;  %3405 = vrcp.f32 %v2370_v19  ;;  %v2372_v43 = vadd.f32 1.0, %v3386_v35  ;;  %v2334_v57 = vmul.f32 1.442695, %v2282_v53  ;;  %v2284_v58 = vsub.f32 0.0, %v2238_v54 }
 0x61a   : > { %3407 = vrcp.f32 %v2371_v36  ;;  %v2373_v59 = vadd.f32 1.0, %v3388_v32  ;;  %v2336_v62 = vmul.f32 1.442695, %v2283_v47  ;;  %v2285_v40 = vsub.f32 0.0, %v2240_v56 }
 0x61b   : > { %v3390_v61 = vpop.eup %3389  ;;  %3409 = vrcp.f32 %v2372_v43  ;;  %v2338_v63 = vmul.f32 1.442695, %v2284_v58 }
 0x61c   : > { %v3392_v0 = vpop.eup %3391  ;;  %3411 = vrcp.f32 %v2373_v59  ;;  %v2340_v60 = vmul.f32 1.442695, %v2285_v40  ;;  %v2243_v3 = vpop.f32.mrb[56].mxu0 }
 0x61d   : > { %v3394_v2 = vpop.eup %3393  ;;  %v2805_v25 = vpack.c.bf16 %v3392_v0, %v3390_v61  ;;  %3413 = vpow2.f32 %v2334_v57  ;;  %v2244_v33 = vadd.f32 %v2243_v3, %v4175_v51  ;;  %v2245_v23 = vpop.f32.mrb[57].mxu0 }
 0x61e   : > { %v3396_v28 = vpop.eup %3395  ;;  %3415 = vpow2.f32 %v2336_v62  ;;  %v2246_v4 = vadd.f32 %v2245_v23, %v4177_v52  ;;  %v2247_v5 = vpop.f32.mrb[58].mxu0 }
 0x61f   : > { %v3398_v6 = vpop.eup %3397  ;;  %2522 = vst [vmem:[%s4199_s24 + $0x20] sm:$0xff] %v2805_v25  ;;  %v2806_v7 = vpack.c.bf16 %v3396_v28, %v3394_v2  ;;  %3417 = vpow2.f32 %v2338_v63  ;;  %v2286_v8 = vsub.f32 0.0, %v2244_v33  ;;  %v2248_v9 = vadd.f32 %v2247_v5, %v4175_v51  ;;  %v2249_v12 = vpop.f32.mrb[59].mxu0 }
 0x620   : > { %v3400_v14 = vpop.eup %3399  ;;  %v2374_v17 = vadd.f32 1.0, %v3398_v6  ;;  %3419 = vpow2.f32 %v2340_v60  ;;  %v2287_v18 = vsub.f32 0.0, %v2246_v4  ;;  %v2250_v21 = vadd.f32 %v2249_v12, %v4177_v52 }
 0x621   : > { %v3402_v24 = vpop.eup %3401  ;;  %2523 = vst [vmem:[%s4199_s24 + $0x28] sm:$0xff] %v2806_v7  ;;  %v2375_v42 = vadd.f32 1.0, %v3400_v14  ;;  %v2288_v26 = vsub.f32 0.0, %v2248_v9  ;;  %v2342_v15 = vmul.f32 1.442695, %v2286_v8 }
 0x622   : > { %v3404_v1 = vpop.eup %3403  ;;  %3421 = vrcp.f32 %v2374_v17  ;;  %v2376_v11 = vadd.f32 1.0, %v3402_v24  ;;  %v2289_v27 = vsub.f32 0.0, %v2250_v21  ;;  %v2344_v20 = vmul.f32 1.442695, %v2287_v18 }
 0x623   : > { %v3406_v29 = vpop.eup %3405  ;;  %3423 = vrcp.f32 %v2375_v42  ;;  %v2377_v30 = vadd.f32 1.0, %v3404_v1  ;;  %v2346_v34 = vmul.f32 1.442695, %v2288_v26 }
 0x624   : > { %v3408_v31 = vpop.eup %3407  ;;  %3425 = vrcp.f32 %v2376_v11  ;;  %v2253_v38 = vpop.f32.mrb[60].mxu0  ;;  %v2348_v44 = vmul.f32 1.442695, %v2289_v27 }
 0x625   : > { %v3410_v39 = vpop.eup %3409  ;;  %v2807_v41 = vpack.c.bf16 %v3408_v31, %v3406_v29  ;;  %3427 = vrcp.f32 %v2377_v30  ;;  %v2254_v45 = vadd.f32 %v2253_v38, %v4175_v51  ;;  %v2255_v16 = vpop.f32.mrb[61].mxu0 }
 0x626   : > { %v3412_v22 = vpop.eup %3411  ;;  %3429 = vpow2.f32 %v2342_v15  ;;  %v2256_v46 = vadd.f32 %v2255_v16, %v4177_v52  ;;  %v2257_v10 = vpop.f32.mrb[62].mxu0 }
 0x627   : > { %v3414_v48 = vpop.eup %3413  ;;  %2524 = vst [vmem:[%s4199_s24 + $0x30] sm:$0xff] %v2807_v41  ;;  %v2808_v37 = vpack.c.bf16 %v3412_v22, %v3410_v39  ;;  %3431 = vpow2.f32 %v2344_v20  ;;  %v2290_v49 = vsub.f32 0.0, %v2254_v45  ;;  %v2258_v50 = vadd.f32 %v2257_v10, %v4175_v51  ;;  %v2259_v13 = vpop.f32.mrb[63].mxu0 }
 0x628   : > { %v3416_v19 = vpop.eup %3415  ;;  %v2378_v53 = vadd.f32 1.0, %v3414_v48  ;;  %3433 = vpow2.f32 %v2346_v34  ;;  %v2291_v54 = vsub.f32 0.0, %v2256_v46  ;;  %v2260_v55 = vadd.f32 %v2259_v13, %v4177_v52 }
 0x629   : > { %v3418_v35 = vpop.eup %3417  ;;  %2525 = vst [vmem:[%s4199_s24 + $0x38] sm:$0xff] %v2808_v37  ;;  %v2379_v36 = vadd.f32 1.0, %v3416_v19  ;;  %3435 = vpow2.f32 %v2348_v44  ;;  %v2292_v47 = vsub.f32 0.0, %v2258_v50  ;;  %v2350_v43 = vmul.f32 1.442695, %v2290_v49 }
 0x62a   : > { %v3420_v56 = vpop.eup %3419  ;;  %3437 = vrcp.f32 %v2378_v53  ;;  %v2380_v32 = vadd.f32 1.0, %v3418_v35  ;;  %v2293_v57 = vsub.f32 0.0, %v2260_v55  ;;  %v2352_v58 = vmul.f32 1.442695, %v2291_v54 }
 0x62b   : > { %3439 = vrcp.f32 %v2379_v36  ;;  %v2381_v51 = vadd.f32 1.0, %v3420_v56  ;;  %v2354_v62 = vmul.f32 1.442695, %v2292_v47 }
 0x62c   : > { %v3422_v59 = vpop.eup %3421  ;;  %3441 = vrcp.f32 %v2380_v32  ;;  %v2356_v52 = vmul.f32 1.442695, %v2293_v57 }
 0x62d   : > { %v3424_v40 = vpop.eup %3423  ;;  %3443 = vrcp.f32 %v2381_v51 }
 0x62e   : > { %v3426_v61 = vpop.eup %3425  ;;  %v2809_v63 = vpack.c.bf16 %v3424_v40, %v3422_v59  ;;  %3445 = vpow2.f32 %v2350_v43 }
 0x62f   : > { %v3428_v0 = vpop.eup %3427  ;;  %3447 = vpow2.f32 %v2352_v58 }
 0x630   : > { %v3430_v60 = vpop.eup %3429  ;;  %2526 = vst [vmem:[%s4199_s24 + $0x40] sm:$0xff] %v2809_v63  ;;  %v2810_v3 = vpack.c.bf16 %v3428_v0, %v3426_v61  ;;  %3449 = vpow2.f32 %v2354_v62 }
 0x631   : > { %v3432_v2 = vpop.eup %3431  ;;  %v2382_v25 = vadd.f32 1.0, %v3430_v60  ;;  %3451 = vpow2.f32 %v2356_v52 }
 0x632   : > { %v3434_v33 = vpop.eup %3433  ;;  %2527 = vst [vmem:[%s4199_s24 + $0x48] sm:$0xff] %v2810_v3  ;;  %v2383_v23 = vadd.f32 1.0, %v3432_v2 }
 0x633   : > { %v3436_v28 = vpop.eup %3435  ;;  %3453 = vrcp.f32 %v2382_v25  ;;  %v2384_v4 = vadd.f32 1.0, %v3434_v33 }
 0x634   : > { %v3438_v5 = vpop.eup %3437  ;;  %3455 = vrcp.f32 %v2383_v23  ;;  %v2385_v6 = vadd.f32 1.0, %v3436_v28 }
 0x635   : > { %v3440_v7 = vpop.eup %3439  ;;  %3457 = vrcp.f32 %v2384_v4 }
 0x636   : > { %v3442_v8 = vpop.eup %3441  ;;  %v2811_v9 = vpack.c.bf16 %v3440_v7, %v3438_v5  ;;  %3459 = vrcp.f32 %v2385_v6 }
 0x637   : > { %v3444_v12 = vpop.eup %3443 }
 0x638   : > { %v3446_v14 = vpop.eup %3445  ;;  %2528 = vst [vmem:[%s4199_s24 + $0x50] sm:$0xff] %v2811_v9  ;;  %v2812_v17 = vpack.c.bf16 %v3444_v12, %v3442_v8 }
 0x639   : > { %v3448_v18 = vpop.eup %3447  ;;  %v2386_v21 = vadd.f32 1.0, %v3446_v14 }
 0x63a   : > { %v3450_v24 = vpop.eup %3449  ;;  %2529 = vst [vmem:[%s4199_s24 + $0x58] sm:$0xff] %v2812_v17  ;;  %v2387_v42 = vadd.f32 1.0, %v3448_v18 }
 0x63b   : > { %v3452_v26 = vpop.eup %3451  ;;  %3461 = vrcp.f32 %v2386_v21  ;;  %v2388_v1 = vadd.f32 1.0, %v3450_v24 }
 0x63c   : > { %3463 = vrcp.f32 %v2387_v42  ;;  %v2389_v11 = vadd.f32 1.0, %v3452_v26 }
 0x63d   : > { %v3454_v15 = vpop.eup %3453  ;;  %3465 = vrcp.f32 %v2388_v1 }
 0x63e   : > { %v3456_v27 = vpop.eup %3455  ;;  %3467 = vrcp.f32 %v2389_v11 }
 0x63f   : > { %v3458_v29 = vpop.eup %3457  ;;  %v2813_v30 = vpack.c.bf16 %v3456_v27, %v3454_v15 }
 0x640   : > { %v3460_v20 = vpop.eup %3459 }
 0x641   : > { %2530 = vst [vmem:[%s4199_s24 + $0x60] sm:$0xff] %v2813_v30  ;;  %v2814_v31 = vpack.c.bf16 %v3460_v20, %v3458_v29 }
 0x643   : > { %2531 = vst [vmem:[%s4199_s24 + $0x68] sm:$0xff] %v2814_v31 }
 0x645   : > { %v3462_v34 = vpop.eup %3461 }
 0x646   : > { %v3464_v38 = vpop.eup %3463 }
 0x647   : > { %v3466_v39 = vpop.eup %3465  ;;  %v2815_v41 = vpack.c.bf16 %v3464_v38, %v3462_v34 }
 0x648   : > { %v3468_v44 = vpop.eup %3467 }
 0x649   : > { %2532 = vst [vmem:[%s4199_s24 + $0x70] sm:$0xff] %v2815_v41  ;;  %v2816_v45 = vpack.c.bf16 %v3468_v44, %v3466_v39 }
 0x64b   : > { %2533 = vst [vmem:[%s4199_s24 + $0x78] sm:$0xff] %v2816_v45 }
 0x64c   : > { %3482 = shalt.err (!%p3479_p3)
}
 0x64d   : > { %s3483_s23 = scalar_lea.hbm %s4235_s17, 2048  ;;  %s3487_s27 = scalar_lea.hbm %s4298_s14, 4096 }
 0x64e   : > { %p3484_p4 = scmp.ne.s32.totalorder %s4235_s17, %s3483_s23  ;;  %p3488_p9 = scmp.lt.u32.totalorder %s4235_s17, %s4298_s14 }
 0x64f   : > { %p3489_p10 = scmp.lt.u32.totalorder %s3487_s27, %s3483_s23  ;;  %p3491_p12 = scmp.lt.u32.totalorder %s3483_s23, %s4235_s17 }
 0x650   : > { %p3485_p7 = pnand %p3484_p4, %p3656_p5 }
 0x651   : > { %p3490_p11 = por %p3489_p10, %p3488_p9 }
 0x652   : > { %p3486_p8 = pneg %p3485_p7 }
 0x653   : > { %p3492_p13 = por %p3491_p12, %p3490_p11 }
 0x655   : > { %p3493_p0 = pnand %p3492_p13, %p3486_p8 }
 0x657   : > { %3496 = shalt.err (!%p3493_p0)
}
 0x658   : > { %s3536_s30 = smov 128   ;;  %s3537_s29 = smov 8  }
 0x659   : > { %3130 = dma.vmem_to_hbm [thread:$0]  (%p3656_p5), %s4237_s20, 2048, %s4235_s17, %s4243_s22, %s3536_s30, %s3536_s30, %s3537_s29  }
 0x65a PF: > { %s4314_s25 = sld [smem:[#allocation5_spill]]  ;;  %p3136_p1 = scmp.ge.s32.totalorder %s3531_s21, 2 }
 0x65c   : > { %p3133_p2 = pnand %p3136_p1, %p3660_p6 }
 0x660   : > { %s2573_s18 = sand.u32 1, %s4314_s25  }
 0x661   : > { %s2574_s23 = scalar_lea.sflag [#allocation3], %s2573_s18 }
 0x662   : > { %3514 = dma.done.wait (!%p3133_p2), %s2574_s23, 2048  }
 0x663   : > { %3516 = vsyncadd (!%p3133_p2), %s2574_s23, 4294965248  ;;  %s4316_s21 = sld [smem:[#allocation7_spill]]  ;;  %s4317_s27 = sld [smem:[#allocation6_spill]] }
 0x664   : > { %s4318_s20 = sld [smem:[#allocation8_spill]]  ;;  %s4319_s18 = smov %s3523_s19 }
 0x669   : > { %p26_p3 = scmp.ge.s32.totalorder %s4316_s21, 4   ;;  %s4320_s19 = smov %s4317_s27 }
 0x66b   :  { %28 = sbr.rel (!%p26_p3) target bundleno = 3 (0x3), region = 126 }
 0x672   :  { %2587 = vsyncpa [#allocation3], 1 }
 0x673   :  { %2589 = vsyncpa [#allocation3 + $0x1], 1 }

</bundles_post_ra>
